<compile_context>
chip_gen: v7x
topology: tpu7x:2x2x1
jax: 0.10.0
libtpu: 0.0.40
codegen_flags: <defaults>
</compile_context>

<pallas_src>
import functools
import math

import jax
import jax.numpy as jnp
from jax.experimental import pallas as pl


# ---------------------------------------------------------------------------
# Kernel
# ---------------------------------------------------------------------------
def _layer_norm(v, gamma, beta, eps=1e-5):
    mu = jnp.mean(v, axis=-1, keepdims=True)
    var = jnp.mean((v - mu) ** 2, axis=-1, keepdims=True)
    return (v - mu) * jax.lax.rsqrt(var + eps) * gamma + beta


def _block_kernel(*refs, B, T, heads, n_att, n_ff):
    """Entire Block forward, fused: activations never leave VMEM."""
    it = iter(refs)
    x_ref = next(it)
    att_layers = [tuple(next(it) for _ in range(4)) for _ in range(n_att)]  # wqkv,bqkv,wproj,bproj
    g_att_ref, b_att_ref = next(it), next(it)
    ff_layers = [tuple(next(it) for _ in range(2)) for _ in range(n_ff)]    # w, b
    g_ff_ref, b_ff_ref = next(it), next(it)
    o_ref = next(it)

    # Causal (tril) mask, built once and reused for every layer / batch / head.
    row = jax.lax.broadcasted_iota(jnp.int32, (T, T), 0)
    col = jax.lax.broadcasted_iota(jnp.int32, (T, T), 1)
    causal = row >= col
    neg_fill = jnp.float32(-1e9)

    g_att = g_att_ref[...]
    b_att = b_att_ref[...]

    x = x_ref[...].astype(jnp.float32)          # (B*T, Cin), flattened batch

    # ---- n_att x [ Attention -> Dropout(identity) -> LayerNorm ] ----------
    for (wqkv_r, bqkv_r, wp_r, bp_r) in att_layers:
        H = wqkv_r.shape[1] // 3                # attention hidden
        hd = H // heads                         # per-head dim
        scale = 1.0 / math.sqrt(hd)

        # One wide fused QKV projection over all B*T rows.
        qkv = jnp.dot(x, wqkv_r[...], preferred_element_type=jnp.float32) + bqkv_r[...]

        batch_outs = []
        for b in range(B):                      # B, heads are tiny -> static unroll
            r0 = b * T
            qkv_b = qkv[r0:r0 + T]              # sublane (row) slice, (T, 3H)
            head_outs = []
            for h in range(heads):
                c0 = h * hd
                qh = qkv_b[:, c0:c0 + hd]               # static lane slices
                kh = qkv_b[:, H + c0:H + c0 + hd]
                vh = qkv_b[:, 2 * H + c0:2 * H + c0 + hd]
                # q @ k^T without materializing a transpose.
                s = jax.lax.dot_general(
                    qh, kh, (((1,), (1,)), ((), ())),
                    preferred_element_type=jnp.float32) * scale
                s = jnp.where(causal, s, neg_fill)      # masked_fill(~mask, -1e9)
                s = s - jnp.max(s, axis=-1, keepdims=True)
                p = jnp.exp(s)
                p = p * pl.reciprocal(jnp.sum(p, axis=-1, keepdims=True),
                                      approx=True)      # softmax (EUP recip)
                head_outs.append(jnp.dot(p, vh, preferred_element_type=jnp.float32))
            batch_outs.append(jnp.concatenate(head_outs, axis=-1))   # (T, H)
        att_in = jnp.concatenate(batch_outs, axis=0)                 # (B*T, H)

        # Single output projection over all rows and all heads.
        att = jnp.dot(att_in, wp_r[...],
                      preferred_element_type=jnp.float32) + bp_r[...]
        # TODO(synk): dropout (att_drop / score dropout) modeled as identity (eval mode).
        x = _layer_norm(att, g_att, b_att)

    # ---- n_feedforward x [ Linear -> ReLU -> LayerNorm ] ------------------
    g_ff = g_ff_ref[...]
    b_ff = b_ff_ref[...]
    for (w_r, bias_r) in ff_layers:
        h_act = jnp.dot(x, w_r[...],
                        preferred_element_type=jnp.float32) + bias_r[...]
        h_act = jnp.maximum(h_act, 0.0)         # ReLU
        x = _layer_norm(h_act, g_ff, b_ff)

    o_ref[...] = x.astype(o_ref.dtype)          # one contiguous (B*T, C) store


# ---------------------------------------------------------------------------
# Host-side wrapper
# ---------------------------------------------------------------------------
def block_forward(x, params, *, att_heads, n_att, n_feedforward):
    B, T, cin = x.shape
    ff_hidden = params["fc"][-1][0].shape[1]

    inputs = [x.reshape(B * T, cin)]
    for i in range(n_att):
        inputs += list(params["att"][i])        # wqkv, bqkv, wproj, bproj
    inputs += list(params["ln_att"])            # shared LN over att layers
    for i in range(n_feedforward):
        inputs += list(params["fc"][i])         # w, b
    inputs += list(params["ln_ff"])             # shared LN over ff layers

    kernel = functools.partial(_block_kernel, B=B, T=T, heads=att_heads,
                               n_att=n_att, n_ff=n_feedforward)
    out_flat = pl.pallas_call(
        kernel,
        out_shape=jax.ShapeDtypeStruct((B * T, ff_hidden), x.dtype),
    )(*inputs)
    return out_flat.reshape(B, T, ff_hidden)


# ---------------------------------------------------------------------------
# Parameter init
# ---------------------------------------------------------------------------
def init_block_params(key, cnn_hidden, att_hidden, n_att,
                      feedforward_hidden, n_feedforward):
    params = {"att": [], "fc": []}
    n_keys = 4 * n_att + 2 * n_feedforward
    keys = iter(jax.random.split(key, n_keys))

    in_dim = cnn_hidden
    for _ in range(n_att):
        wqkv = 0.02 * jax.random.normal(next(keys), (in_dim, 3 * att_hidden), jnp.float32)
        bqkv = 0.02 * jax.random.normal(next(keys), (1, 3 * att_hidden), jnp.float32)
        wproj = 0.02 * jax.random.normal(next(keys), (att_hidden, att_hidden), jnp.float32)
        bproj = 0.02 * jax.random.normal(next(keys), (1, att_hidden), jnp.float32)
        params["att"].append((wqkv, bqkv, wproj, bproj))
        in_dim = att_hidden

    # Shared LayerNorm params (module builds [LayerNorm(att_hidden)] * n_att).
    params["ln_att"] = (jnp.ones((1, att_hidden), jnp.float32),
                        jnp.zeros((1, att_hidden), jnp.float32))
    params["ln_ff"] = (jnp.ones((1, feedforward_hidden), jnp.float32),
                       jnp.zeros((1, feedforward_hidden), jnp.float32))

    in_dim = att_hidden
    for _ in range(n_feedforward):
        w = 0.02 * jax.random.normal(next(keys), (in_dim, feedforward_hidden), jnp.float32)
        b = 0.02 * jax.random.normal(next(keys), (1, feedforward_hidden), jnp.float32)
        params["fc"].append((w, b))
        in_dim = feedforward_hidden
    return params


# ---------------------------------------------------------------------------
if __name__ == "__main__":
    B = 2
    max_T = 8                 # sequence length == max_T (mask is (max_T, max_T))
    cnn_hidden = 32
    att_hidden = 32
    att_heads = 4
    feedforward_hidden = 32
    n_att = 2
    n_feedforward = 2
    drop_p = 0.0              # TODO(synk): dropout modeled as identity (eval mode)

    key = jax.random.PRNGKey(0)
    kx, kp = jax.random.split(key)
    x = jax.random.normal(kx, (B, max_T, cnn_hidden), dtype=jnp.float32)
    params = init_block_params(kp, cnn_hidden, att_hidden, n_att,
                               feedforward_hidden, n_feedforward)

    fwd = jax.jit(functools.partial(block_forward, att_heads=att_heads,
                                    n_att=n_att, n_feedforward=n_feedforward))
    y = fwd(x, params)
    jax.block_until_ready(y)
    assert y.shape == (B, max_T, feedforward_hidden)
    assert bool(jnp.all(jnp.isfinite(y)))
    print("KERNEL_OK")
</pallas_src>

<mosaic_0001>
module attributes {stable_mosaic.version = 11 : i64} {
  func.func @_block_kernel(%arg0: memref<16x32xf32, #tpu.memory_space<vmem>>, %arg1: memref<32x96xf32, #tpu.memory_space<vmem>>, %arg2: memref<1x96xf32, #tpu.memory_space<vmem>>, %arg3: memref<32x32xf32, #tpu.memory_space<vmem>>, %arg4: memref<1x32xf32, #tpu.memory_space<vmem>>, %arg5: memref<32x96xf32, #tpu.memory_space<vmem>>, %arg6: memref<1x96xf32, #tpu.memory_space<vmem>>, %arg7: memref<32x32xf32, #tpu.memory_space<vmem>>, %arg8: memref<1x32xf32, #tpu.memory_space<vmem>>, %arg9: memref<1x32xf32, #tpu.memory_space<vmem>>, %arg10: memref<1x32xf32, #tpu.memory_space<vmem>>, %arg11: memref<32x32xf32, #tpu.memory_space<vmem>>, %arg12: memref<1x32xf32, #tpu.memory_space<vmem>>, %arg13: memref<32x32xf32, #tpu.memory_space<vmem>>, %arg14: memref<1x32xf32, #tpu.memory_space<vmem>>, %arg15: memref<1x32xf32, #tpu.memory_space<vmem>>, %arg16: memref<1x32xf32, #tpu.memory_space<vmem>>, %arg17: memref<16x32xf32, #tpu.memory_space<vmem>>) attributes {dimension_semantics = [], scalar_prefetch = 0 : i64, scratch_operands = 0 : i64, tpu.core_type = #tpu.core_type<tc>} {
    %0 = tpu.iota {dimensions = array<i32: 0>} : vector<8x8xi32>
    %1 = tpu.iota {dimensions = array<i32: 1>} : vector<8x8xi32>
    %2 = arith.cmpi sge, %0, %1 : vector<8x8xi32>
    %c0 = arith.constant 0 : index
    %c0_0 = arith.constant 0 : index
    %3 = vector.load %arg9[%c0, %c0_0] : memref<1x32xf32, #tpu.memory_space<vmem>>, vector<1x32xf32>
    %c0_1 = arith.constant 0 : index
    %c0_2 = arith.constant 0 : index
    %4 = vector.load %arg10[%c0_1, %c0_2] : memref<1x32xf32, #tpu.memory_space<vmem>>, vector<1x32xf32>
    %c0_3 = arith.constant 0 : index
    %c0_4 = arith.constant 0 : index
    %5 = vector.load %arg0[%c0_3, %c0_4] : memref<16x32xf32, #tpu.memory_space<vmem>>, vector<16x32xf32>
    %c0_5 = arith.constant 0 : index
    %c0_6 = arith.constant 0 : index
    %6 = vector.load %arg1[%c0_5, %c0_6] : memref<32x96xf32, #tpu.memory_space<vmem>>, vector<32x96xf32>
    %cst = arith.constant dense<0.000000e+00> : vector<16x96xf32>
    %7 = tpu.matmul %5, %6, %cst {dimension_numbers = #tpu.dot_dimension_numbers<[1], [0], [0], [1], [0, 0, 1, 1], [], []>} : vector<16x32xf32>, vector<32x96xf32>, vector<16x96xf32> -> vector<16x96xf32>
    %c0_7 = arith.constant 0 : index
    %c0_8 = arith.constant 0 : index
    %8 = vector.load %arg2[%c0_7, %c0_8] : memref<1x96xf32, #tpu.memory_space<vmem>>, vector<1x96xf32>
    %9 = vector.broadcast %8 : vector<1x96xf32> to vector<16x96xf32>
    %10 = arith.addf %7, %9 : vector<16x96xf32>
    %11 = vector.extract_strided_slice %10 {offsets = [0, 0], sizes = [8, 96], strides = [1, 1]} : vector<16x96xf32> to vector<8x96xf32>
    %12 = vector.extract_strided_slice %11 {offsets = [0, 0], sizes = [8, 8], strides = [1, 1]} : vector<8x96xf32> to vector<8x8xf32>
    %13 = vector.extract_strided_slice %11 {offsets = [0, 32], sizes = [8, 8], strides = [1, 1]} : vector<8x96xf32> to vector<8x8xf32>
    %14 = vector.extract_strided_slice %11 {offsets = [0, 64], sizes = [8, 8], strides = [1, 1]} : vector<8x96xf32> to vector<8x8xf32>
    %cst_9 = arith.constant dense<0.000000e+00> : vector<8x8xf32>
    %15 = tpu.matmul %12, %13, %cst_9 {dimension_numbers = #tpu.dot_dimension_numbers<[1], [1], [0], [0], [0, 0, 1, 0], [], []>} : vector<8x8xf32>, vector<8x8xf32>, vector<8x8xf32> -> vector<8x8xf32>
    %cst_10 = arith.constant 0.353553385 : f32
    %16 = vector.broadcast %cst_10 : f32 to vector<8x8xf32>
    %17 = arith.mulf %15, %16 : vector<8x8xf32>
    %cst_11 = arith.constant -1.000000e+09 : f32
    %18 = vector.broadcast %cst_11 : f32 to vector<8x8xf32>
    %19 = arith.select %2, %17, %18 : vector<8x8xi1>, vector<8x8xf32>
    %cst_12 = arith.constant dense<0xFF800000> : vector<8xf32>
    %20 = vector.multi_reduction <maximumf>, %19, %cst_12 [1] : vector<8x8xf32> to vector<8xf32>
    %21 = vector.shape_cast %20 : vector<8xf32> to vector<8x1xf32>
    %22 = vector.broadcast %21 : vector<8x1xf32> to vector<8x8xf32>
    %23 = arith.subf %19, %22 : vector<8x8xf32>
    %24 = math.exp %23 : vector<8x8xf32>
    %cst_13 = arith.constant dense<0.000000e+00> : vector<8xf32>
    %25 = vector.multi_reduction <add>, %24, %cst_13 [1] : vector<8x8xf32> to vector<8xf32>
    %26 = vector.shape_cast %25 : vector<8xf32> to vector<8x1xf32>
    %27 = tpu.reciprocal %26 {approx = true} : vector<8x1xf32> -> vector<8x1xf32>
    %28 = vector.broadcast %27 : vector<8x1xf32> to vector<8x8xf32>
    %29 = arith.mulf %24, %28 : vector<8x8xf32>
    %cst_14 = arith.constant dense<0.000000e+00> : vector<8x8xf32>
    %30 = tpu.matmul %29, %14, %cst_14 {dimension_numbers = #tpu.dot_dimension_numbers<[1], [0], [0], [1], [0, 0, 1, 1], [], []>} : vector<8x8xf32>, vector<8x8xf32>, vector<8x8xf32> -> vector<8x8xf32>
    %31 = vector.extract_strided_slice %11 {offsets = [0, 8], sizes = [8, 8], strides = [1, 1]} : vector<8x96xf32> to vector<8x8xf32>
    %32 = vector.extract_strided_slice %11 {offsets = [0, 40], sizes = [8, 8], strides = [1, 1]} : vector<8x96xf32> to vector<8x8xf32>
    %33 = vector.extract_strided_slice %11 {offsets = [0, 72], sizes = [8, 8], strides = [1, 1]} : vector<8x96xf32> to vector<8x8xf32>
    %cst_15 = arith.constant dense<0.000000e+00> : vector<8x8xf32>
    %34 = tpu.matmul %31, %32, %cst_15 {dimension_numbers = #tpu.dot_dimension_numbers<[1], [1], [0], [0], [0, 0, 1, 0], [], []>} : vector<8x8xf32>, vector<8x8xf32>, vector<8x8xf32> -> vector<8x8xf32>
    %cst_16 = arith.constant 0.353553385 : f32
    %35 = vector.broadcast %cst_16 : f32 to vector<8x8xf32>
    %36 = arith.mulf %34, %35 : vector<8x8xf32>
    %cst_17 = arith.constant -1.000000e+09 : f32
    %37 = vector.broadcast %cst_17 : f32 to vector<8x8xf32>
    %38 = arith.select %2, %36, %37 : vector<8x8xi1>, vector<8x8xf32>
    %cst_18 = arith.constant dense<0xFF800000> : vector<8xf32>
    %39 = vector.multi_reduction <maximumf>, %38, %cst_18 [1] : vector<8x8xf32> to vector<8xf32>
    %40 = vector.shape_cast %39 : vector<8xf32> to vector<8x1xf32>
    %41 = vector.broadcast %40 : vector<8x1xf32> to vector<8x8xf32>
    %42 = arith.subf %38, %41 : vector<8x8xf32>
    %43 = math.exp %42 : vector<8x8xf32>
    %cst_19 = arith.constant dense<0.000000e+00> : vector<8xf32>
    %44 = vector.multi_reduction <add>, %43, %cst_19 [1] : vector<8x8xf32> to vector<8xf32>
    %45 = vector.shape_cast %44 : vector<8xf32> to vector<8x1xf32>
    %46 = tpu.reciprocal %45 {approx = true} : vector<8x1xf32> -> vector<8x1xf32>
    %47 = vector.broadcast %46 : vector<8x1xf32> to vector<8x8xf32>
    %48 = arith.mulf %43, %47 : vector<8x8xf32>
    %cst_20 = arith.constant dense<0.000000e+00> : vector<8x8xf32>
    %49 = tpu.matmul %48, %33, %cst_20 {dimension_numbers = #tpu.dot_dimension_numbers<[1], [0], [0], [1], [0, 0, 1, 1], [], []>} : vector<8x8xf32>, vector<8x8xf32>, vector<8x8xf32> -> vector<8x8xf32>
    %50 = vector.extract_strided_slice %11 {offsets = [0, 16], sizes = [8, 8], strides = [1, 1]} : vector<8x96xf32> to vector<8x8xf32>
    %51 = vector.extract_strided_slice %11 {offsets = [0, 48], sizes = [8, 8], strides = [1, 1]} : vector<8x96xf32> to vector<8x8xf32>
    %52 = vector.extract_strided_slice %11 {offsets = [0, 80], sizes = [8, 8], strides = [1, 1]} : vector<8x96xf32> to vector<8x8xf32>
    %cst_21 = arith.constant dense<0.000000e+00> : vector<8x8xf32>
    %53 = tpu.matmul %50, %51, %cst_21 {dimension_numbers = #tpu.dot_dimension_numbers<[1], [1], [0], [0], [0, 0, 1, 0], [], []>} : vector<8x8xf32>, vector<8x8xf32>, vector<8x8xf32> -> vector<8x8xf32>
    %cst_22 = arith.constant 0.353553385 : f32
    %54 = vector.broadcast %cst_22 : f32 to vector<8x8xf32>
    %55 = arith.mulf %53, %54 : vector<8x8xf32>
    %cst_23 = arith.constant -1.000000e+09 : f32
    %56 = vector.broadcast %cst_23 : f32 to vector<8x8xf32>
    %57 = arith.select %2, %55, %56 : vector<8x8xi1>, vector<8x8xf32>
    %cst_24 = arith.constant dense<0xFF800000> : vector<8xf32>
    %58 = vector.multi_reduction <maximumf>, %57, %cst_24 [1] : vector<8x8xf32> to vector<8xf32>
    %59 = vector.shape_cast %58 : vector<8xf32> to vector<8x1xf32>
    %60 = vector.broadcast %59 : vector<8x1xf32> to vector<8x8xf32>
    %61 = arith.subf %57, %60 : vector<8x8xf32>
    %62 = math.exp %61 : vector<8x8xf32>
    %cst_25 = arith.constant dense<0.000000e+00> : vector<8xf32>
    %63 = vector.multi_reduction <add>, %62, %cst_25 [1] : vector<8x8xf32> to vector<8xf32>
    %64 = vector.shape_cast %63 : vector<8xf32> to vector<8x1xf32>
    %65 = tpu.reciprocal %64 {approx = true} : vector<8x1xf32> -> vector<8x1xf32>
    %66 = vector.broadcast %65 : vector<8x1xf32> to vector<8x8xf32>
    %67 = arith.mulf %62, %66 : vector<8x8xf32>
    %cst_26 = arith.constant dense<0.000000e+00> : vector<8x8xf32>
    %68 = tpu.matmul %67, %52, %cst_26 {dimension_numbers = #tpu.dot_dimension_numbers<[1], [0], [0], [1], [0, 0, 1, 1], [], []>} : vector<8x8xf32>, vector<8x8xf32>, vector<8x8xf32> -> vector<8x8xf32>
    %69 = vector.extract_strided_slice %11 {offsets = [0, 24], sizes = [8, 8], strides = [1, 1]} : vector<8x96xf32> to vector<8x8xf32>
    %70 = vector.extract_strided_slice %11 {offsets = [0, 56], sizes = [8, 8], strides = [1, 1]} : vector<8x96xf32> to vector<8x8xf32>
    %71 = vector.extract_strided_slice %11 {offsets = [0, 88], sizes = [8, 8], strides = [1, 1]} : vector<8x96xf32> to vector<8x8xf32>
    %cst_27 = arith.constant dense<0.000000e+00> : vector<8x8xf32>
    %72 = tpu.matmul %69, %70, %cst_27 {dimension_numbers = #tpu.dot_dimension_numbers<[1], [1], [0], [0], [0, 0, 1, 0], [], []>} : vector<8x8xf32>, vector<8x8xf32>, vector<8x8xf32> -> vector<8x8xf32>
    %cst_28 = arith.constant 0.353553385 : f32
    %73 = vector.broadcast %cst_28 : f32 to vector<8x8xf32>
    %74 = arith.mulf %72, %73 : vector<8x8xf32>
    %cst_29 = arith.constant -1.000000e+09 : f32
    %75 = vector.broadcast %cst_29 : f32 to vector<8x8xf32>
    %76 = arith.select %2, %74, %75 : vector<8x8xi1>, vector<8x8xf32>
    %cst_30 = arith.constant dense<0xFF800000> : vector<8xf32>
    %77 = vector.multi_reduction <maximumf>, %76, %cst_30 [1] : vector<8x8xf32> to vector<8xf32>
    %78 = vector.shape_cast %77 : vector<8xf32> to vector<8x1xf32>
    %79 = vector.broadcast %78 : vector<8x1xf32> to vector<8x8xf32>
    %80 = arith.subf %76, %79 : vector<8x8xf32>
    %81 = math.exp %80 : vector<8x8xf32>
    %cst_31 = arith.constant dense<0.000000e+00> : vector<8xf32>
    %82 = vector.multi_reduction <add>, %81, %cst_31 [1] : vector<8x8xf32> to vector<8xf32>
    %83 = vector.shape_cast %82 : vector<8xf32> to vector<8x1xf32>
    %84 = tpu.reciprocal %83 {approx = true} : vector<8x1xf32> -> vector<8x1xf32>
    %85 = vector.broadcast %84 : vector<8x1xf32> to vector<8x8xf32>
    %86 = arith.mulf %81, %85 : vector<8x8xf32>
    %cst_32 = arith.constant dense<0.000000e+00> : vector<8x8xf32>
    %87 = tpu.matmul %86, %71, %cst_32 {dimension_numbers = #tpu.dot_dimension_numbers<[1], [0], [0], [1], [0, 0, 1, 1], [], []>} : vector<8x8xf32>, vector<8x8xf32>, vector<8x8xf32> -> vector<8x8xf32>
    %88 = tpu.concatenate %30, %49, %68, %87 in 1 : vector<8x8xf32>, vector<8x8xf32>, vector<8x8xf32>, vector<8x8xf32> -> vector<8x32xf32>
    %89 = vector.extract_strided_slice %10 {offsets = [8, 0], sizes = [8, 96], strides = [1, 1]} : vector<16x96xf32> to vector<8x96xf32>
    %90 = vector.extract_strided_slice %89 {offsets = [0, 0], sizes = [8, 8], strides = [1, 1]} : vector<8x96xf32> to vector<8x8xf32>
    %91 = vector.extract_strided_slice %89 {offsets = [0, 32], sizes = [8, 8], strides = [1, 1]} : vector<8x96xf32> to vector<8x8xf32>
    %92 = vector.extract_strided_slice %89 {offsets = [0, 64], sizes = [8, 8], strides = [1, 1]} : vector<8x96xf32> to vector<8x8xf32>
    %cst_33 = arith.constant dense<0.000000e+00> : vector<8x8xf32>
    %93 = tpu.matmul %90, %91, %cst_33 {dimension_numbers = #tpu.dot_dimension_numbers<[1], [1], [0], [0], [0, 0, 1, 0], [], []>} : vector<8x8xf32>, vector<8x8xf32>, vector<8x8xf32> -> vector<8x8xf32>
    %cst_34 = arith.constant 0.353553385 : f32
    %94 = vector.broadcast %cst_34 : f32 to vector<8x8xf32>
    %95 = arith.mulf %93, %94 : vector<8x8xf32>
    %cst_35 = arith.constant -1.000000e+09 : f32
    %96 = vector.broadcast %cst_35 : f32 to vector<8x8xf32>
    %97 = arith.select %2, %95, %96 : vector<8x8xi1>, vector<8x8xf32>
    %cst_36 = arith.constant dense<0xFF800000> : vector<8xf32>
    %98 = vector.multi_reduction <maximumf>, %97, %cst_36 [1] : vector<8x8xf32> to vector<8xf32>
    %99 = vector.shape_cast %98 : vector<8xf32> to vector<8x1xf32>
    %100 = vector.broadcast %99 : vector<8x1xf32> to vector<8x8xf32>
    %101 = arith.subf %97, %100 : vector<8x8xf32>
    %102 = math.exp %101 : vector<8x8xf32>
    %cst_37 = arith.constant dense<0.000000e+00> : vector<8xf32>
    %103 = vector.multi_reduction <add>, %102, %cst_37 [1] : vector<8x8xf32> to vector<8xf32>
    %104 = vector.shape_cast %103 : vector<8xf32> to vector<8x1xf32>
    %105 = tpu.reciprocal %104 {approx = true} : vector<8x1xf32> -> vector<8x1xf32>
    %106 = vector.broadcast %105 : vector<8x1xf32> to vector<8x8xf32>
    %107 = arith.mulf %102, %106 : vector<8x8xf32>
    %cst_38 = arith.constant dense<0.000000e+00> : vector<8x8xf32>
    %108 = tpu.matmul %107, %92, %cst_38 {dimension_numbers = #tpu.dot_dimension_numbers<[1], [0], [0], [1], [0, 0, 1, 1], [], []>} : vector<8x8xf32>, vector<8x8xf32>, vector<8x8xf32> -> vector<8x8xf32>
    %109 = vector.extract_strided_slice %89 {offsets = [0, 8], sizes = [8, 8], strides = [1, 1]} : vector<8x96xf32> to vector<8x8xf32>
    %110 = vector.extract_strided_slice %89 {offsets = [0, 40], sizes = [8, 8], strides = [1, 1]} : vector<8x96xf32> to vector<8x8xf32>
    %111 = vector.extract_strided_slice %89 {offsets = [0, 72], sizes = [8, 8], strides = [1, 1]} : vector<8x96xf32> to vector<8x8xf32>
    %cst_39 = arith.constant dense<0.000000e+00> : vector<8x8xf32>
    %112 = tpu.matmul %109, %110, %cst_39 {dimension_numbers = #tpu.dot_dimension_numbers<[1], [1], [0], [0], [0, 0, 1, 0], [], []>} : vector<8x8xf32>, vector<8x8xf32>, vector<8x8xf32> -> vector<8x8xf32>
    %cst_40 = arith.constant 0.353553385 : f32
    %113 = vector.broadcast %cst_40 : f32 to vector<8x8xf32>
    %114 = arith.mulf %112, %113 : vector<8x8xf32>
    %cst_41 = arith.constant -1.000000e+09 : f32
    %115 = vector.broadcast %cst_41 : f32 to vector<8x8xf32>
    %116 = arith.select %2, %114, %115 : vector<8x8xi1>, vector<8x8xf32>
    %cst_42 = arith.constant dense<0xFF800000> : vector<8xf32>
    %117 = vector.multi_reduction <maximumf>, %116, %cst_42 [1] : vector<8x8xf32> to vector<8xf32>
    %118 = vector.shape_cast %117 : vector<8xf32> to vector<8x1xf32>
    %119 = vector.broadcast %118 : vector<8x1xf32> to vector<8x8xf32>
    %120 = arith.subf %116, %119 : vector<8x8xf32>
    %121 = math.exp %120 : vector<8x8xf32>
    %cst_43 = arith.constant dense<0.000000e+00> : vector<8xf32>
    %122 = vector.multi_reduction <add>, %121, %cst_43 [1] : vector<8x8xf32> to vector<8xf32>
    %123 = vector.shape_cast %122 : vector<8xf32> to vector<8x1xf32>
    %124 = tpu.reciprocal %123 {approx = true} : vector<8x1xf32> -> vector<8x1xf32>
    %125 = vector.broadcast %124 : vector<8x1xf32> to vector<8x8xf32>
    %126 = arith.mulf %121, %125 : vector<8x8xf32>
    %cst_44 = arith.constant dense<0.000000e+00> : vector<8x8xf32>
    %127 = tpu.matmul %126, %111, %cst_44 {dimension_numbers = #tpu.dot_dimension_numbers<[1], [0], [0], [1], [0, 0, 1, 1], [], []>} : vector<8x8xf32>, vector<8x8xf32>, vector<8x8xf32> -> vector<8x8xf32>
    %128 = vector.extract_strided_slice %89 {offsets = [0, 16], sizes = [8, 8], strides = [1, 1]} : vector<8x96xf32> to vector<8x8xf32>
    %129 = vector.extract_strided_slice %89 {offsets = [0, 48], sizes = [8, 8], strides = [1, 1]} : vector<8x96xf32> to vector<8x8xf32>
    %130 = vector.extract_strided_slice %89 {offsets = [0, 80], sizes = [8, 8], strides = [1, 1]} : vector<8x96xf32> to vector<8x8xf32>
    %cst_45 = arith.constant dense<0.000000e+00> : vector<8x8xf32>
    %131 = tpu.matmul %128, %129, %cst_45 {dimension_numbers = #tpu.dot_dimension_numbers<[1], [1], [0], [0], [0, 0, 1, 0], [], []>} : vector<8x8xf32>, vector<8x8xf32>, vector<8x8xf32> -> vector<8x8xf32>
    %cst_46 = arith.constant 0.353553385 : f32
    %132 = vector.broadcast %cst_46 : f32 to vector<8x8xf32>
    %133 = arith.mulf %131, %132 : vector<8x8xf32>
    %cst_47 = arith.constant -1.000000e+09 : f32
    %134 = vector.broadcast %cst_47 : f32 to vector<8x8xf32>
    %135 = arith.select %2, %133, %134 : vector<8x8xi1>, vector<8x8xf32>
    %cst_48 = arith.constant dense<0xFF800000> : vector<8xf32>
    %136 = vector.multi_reduction <maximumf>, %135, %cst_48 [1] : vector<8x8xf32> to vector<8xf32>
    %137 = vector.shape_cast %136 : vector<8xf32> to vector<8x1xf32>
    %138 = vector.broadcast %137 : vector<8x1xf32> to vector<8x8xf32>
    %139 = arith.subf %135, %138 : vector<8x8xf32>
    %140 = math.exp %139 : vector<8x8xf32>
    %cst_49 = arith.constant dense<0.000000e+00> : vector<8xf32>
    %141 = vector.multi_reduction <add>, %140, %cst_49 [1] : vector<8x8xf32> to vector<8xf32>
    %142 = vector.shape_cast %141 : vector<8xf32> to vector<8x1xf32>
    %143 = tpu.reciprocal %142 {approx = true} : vector<8x1xf32> -> vector<8x1xf32>
    %144 = vector.broadcast %143 : vector<8x1xf32> to vector<8x8xf32>
    %145 = arith.mulf %140, %144 : vector<8x8xf32>
    %cst_50 = arith.constant dense<0.000000e+00> : vector<8x8xf32>
    %146 = tpu.matmul %145, %130, %cst_50 {dimension_numbers = #tpu.dot_dimension_numbers<[1], [0], [0], [1], [0, 0, 1, 1], [], []>} : vector<8x8xf32>, vector<8x8xf32>, vector<8x8xf32> -> vector<8x8xf32>
    %147 = vector.extract_strided_slice %89 {offsets = [0, 24], sizes = [8, 8], strides = [1, 1]} : vector<8x96xf32> to vector<8x8xf32>
    %148 = vector.extract_strided_slice %89 {offsets = [0, 56], sizes = [8, 8], strides = [1, 1]} : vector<8x96xf32> to vector<8x8xf32>
    %149 = vector.extract_strided_slice %89 {offsets = [0, 88], sizes = [8, 8], strides = [1, 1]} : vector<8x96xf32> to vector<8x8xf32>
    %cst_51 = arith.constant dense<0.000000e+00> : vector<8x8xf32>
    %150 = tpu.matmul %147, %148, %cst_51 {dimension_numbers = #tpu.dot_dimension_numbers<[1], [1], [0], [0], [0, 0, 1, 0], [], []>} : vector<8x8xf32>, vector<8x8xf32>, vector<8x8xf32> -> vector<8x8xf32>
    %cst_52 = arith.constant 0.353553385 : f32
    %151 = vector.broadcast %cst_52 : f32 to vector<8x8xf32>
    %152 = arith.mulf %150, %151 : vector<8x8xf32>
    %cst_53 = arith.constant -1.000000e+09 : f32
    %153 = vector.broadcast %cst_53 : f32 to vector<8x8xf32>
    %154 = arith.select %2, %152, %153 : vector<8x8xi1>, vector<8x8xf32>
    %cst_54 = arith.constant dense<0xFF800000> : vector<8xf32>
    %155 = vector.multi_reduction <maximumf>, %154, %cst_54 [1] : vector<8x8xf32> to vector<8xf32>
    %156 = vector.shape_cast %155 : vector<8xf32> to vector<8x1xf32>
    %157 = vector.broadcast %156 : vector<8x1xf32> to vector<8x8xf32>
    %158 = arith.subf %154, %157 : vector<8x8xf32>
    %159 = math.exp %158 : vector<8x8xf32>
    %cst_55 = arith.constant dense<0.000000e+00> : vector<8xf32>
    %160 = vector.multi_reduction <add>, %159, %cst_55 [1] : vector<8x8xf32> to vector<8xf32>
    %161 = vector.shape_cast %160 : vector<8xf32> to vector<8x1xf32>
    %162 = tpu.reciprocal %161 {approx = true} : vector<8x1xf32> -> vector<8x1xf32>
    %163 = vector.broadcast %162 : vector<8x1xf32> to vector<8x8xf32>
    %164 = arith.mulf %159, %163 : vector<8x8xf32>
    %cst_56 = arith.constant dense<0.000000e+00> : vector<8x8xf32>
    %165 = tpu.matmul %164, %149, %cst_56 {dimension_numbers = #tpu.dot_dimension_numbers<[1], [0], [0], [1], [0, 0, 1, 1], [], []>} : vector<8x8xf32>, vector<8x8xf32>, vector<8x8xf32> -> vector<8x8xf32>
    %166 = tpu.concatenate %108, %127, %146, %165 in 1 : vector<8x8xf32>, vector<8x8xf32>, vector<8x8xf32>, vector<8x8xf32> -> vector<8x32xf32>
    %167 = tpu.concatenate %88, %166 in 0 : vector<8x32xf32>, vector<8x32xf32> -> vector<16x32xf32>
    %c0_57 = arith.constant 0 : index
    %c0_58 = arith.constant 0 : index
    %168 = vector.load %arg3[%c0_57, %c0_58] : memref<32x32xf32, #tpu.memory_space<vmem>>, vector<32x32xf32>
    %cst_59 = arith.constant dense<0.000000e+00> : vector<16x32xf32>
    %169 = tpu.matmul %167, %168, %cst_59 {dimension_numbers = #tpu.dot_dimension_numbers<[1], [0], [0], [1], [0, 0, 1, 1], [], []>} : vector<16x32xf32>, vector<32x32xf32>, vector<16x32xf32> -> vector<16x32xf32>
    %c0_60 = arith.constant 0 : index
    %c0_61 = arith.constant 0 : index
    %170 = vector.load %arg4[%c0_60, %c0_61] : memref<1x32xf32, #tpu.memory_space<vmem>>, vector<1x32xf32>
    %171 = vector.broadcast %170 : vector<1x32xf32> to vector<16x32xf32>
    %172 = arith.addf %169, %171 : vector<16x32xf32>
    %cst_62 = arith.constant dense<0.000000e+00> : vector<16xf32>
    %173 = vector.multi_reduction <add>, %172, %cst_62 [1] : vector<16x32xf32> to vector<16xf32>
    %174 = vector.shape_cast %173 : vector<16xf32> to vector<16x1xf32>
    %cst_63 = arith.constant 3.200000e+01 : f32
    %175 = vector.broadcast %cst_63 : f32 to vector<16x1xf32>
    %176 = arith.divf %174, %175 : vector<16x1xf32>
    %177 = vector.broadcast %176 : vector<16x1xf32> to vector<16x32xf32>
    %178 = arith.subf %172, %177 : vector<16x32xf32>
    %179 = arith.mulf %178, %178 : vector<16x32xf32>
    %cst_64 = arith.constant dense<0.000000e+00> : vector<16xf32>
    %180 = vector.multi_reduction <add>, %179, %cst_64 [1] : vector<16x32xf32> to vector<16xf32>
    %181 = vector.shape_cast %180 : vector<16xf32> to vector<16x1xf32>
    %cst_65 = arith.constant 3.200000e+01 : f32
    %182 = vector.broadcast %cst_65 : f32 to vector<16x1xf32>
    %183 = arith.divf %181, %182 : vector<16x1xf32>
    %184 = vector.broadcast %176 : vector<16x1xf32> to vector<16x32xf32>
    %185 = arith.subf %172, %184 : vector<16x32xf32>
    %cst_66 = arith.constant 9.99999974E-6 : f32
    %186 = vector.broadcast %cst_66 : f32 to vector<16x1xf32>
    %187 = arith.addf %183, %186 : vector<16x1xf32>
    %188 = math.rsqrt %187 : vector<16x1xf32>
    %189 = vector.broadcast %188 : vector<16x1xf32> to vector<16x32xf32>
    %190 = arith.mulf %185, %189 : vector<16x32xf32>
    %191 = vector.broadcast %3 : vector<1x32xf32> to vector<16x32xf32>
    %192 = arith.mulf %190, %191 : vector<16x32xf32>
    %193 = vector.broadcast %4 : vector<1x32xf32> to vector<16x32xf32>
    %194 = arith.addf %192, %193 : vector<16x32xf32>
    %c0_67 = arith.constant 0 : index
    %c0_68 = arith.constant 0 : index
    %195 = vector.load %arg5[%c0_67, %c0_68] : memref<32x96xf32, #tpu.memory_space<vmem>>, vector<32x96xf32>
    %cst_69 = arith.constant dense<0.000000e+00> : vector<16x96xf32>
    %196 = tpu.matmul %194, %195, %cst_69 {dimension_numbers = #tpu.dot_dimension_numbers<[1], [0], [0], [1], [0, 0, 1, 1], [], []>} : vector<16x32xf32>, vector<32x96xf32>, vector<16x96xf32> -> vector<16x96xf32>
    %c0_70 = arith.constant 0 : index
    %c0_71 = arith.constant 0 : index
    %197 = vector.load %arg6[%c0_70, %c0_71] : memref<1x96xf32, #tpu.memory_space<vmem>>, vector<1x96xf32>
    %198 = vector.broadcast %197 : vector<1x96xf32> to vector<16x96xf32>
    %199 = arith.addf %196, %198 : vector<16x96xf32>
    %200 = vector.extract_strided_slice %199 {offsets = [0, 0], sizes = [8, 96], strides = [1, 1]} : vector<16x96xf32> to vector<8x96xf32>
    %201 = vector.extract_strided_slice %200 {offsets = [0, 0], sizes = [8, 8], strides = [1, 1]} : vector<8x96xf32> to vector<8x8xf32>
    %202 = vector.extract_strided_slice %200 {offsets = [0, 32], sizes = [8, 8], strides = [1, 1]} : vector<8x96xf32> to vector<8x8xf32>
    %203 = vector.extract_strided_slice %200 {offsets = [0, 64], sizes = [8, 8], strides = [1, 1]} : vector<8x96xf32> to vector<8x8xf32>
    %cst_72 = arith.constant dense<0.000000e+00> : vector<8x8xf32>
    %204 = tpu.matmul %201, %202, %cst_72 {dimension_numbers = #tpu.dot_dimension_numbers<[1], [1], [0], [0], [0, 0, 1, 0], [], []>} : vector<8x8xf32>, vector<8x8xf32>, vector<8x8xf32> -> vector<8x8xf32>
    %cst_73 = arith.constant 0.353553385 : f32
    %205 = vector.broadcast %cst_73 : f32 to vector<8x8xf32>
    %206 = arith.mulf %204, %205 : vector<8x8xf32>
    %cst_74 = arith.constant -1.000000e+09 : f32
    %207 = vector.broadcast %cst_74 : f32 to vector<8x8xf32>
    %208 = arith.select %2, %206, %207 : vector<8x8xi1>, vector<8x8xf32>
    %cst_75 = arith.constant dense<0xFF800000> : vector<8xf32>
    %209 = vector.multi_reduction <maximumf>, %208, %cst_75 [1] : vector<8x8xf32> to vector<8xf32>
    %210 = vector.shape_cast %209 : vector<8xf32> to vector<8x1xf32>
    %211 = vector.broadcast %210 : vector<8x1xf32> to vector<8x8xf32>
    %212 = arith.subf %208, %211 : vector<8x8xf32>
    %213 = math.exp %212 : vector<8x8xf32>
    %cst_76 = arith.constant dense<0.000000e+00> : vector<8xf32>
    %214 = vector.multi_reduction <add>, %213, %cst_76 [1] : vector<8x8xf32> to vector<8xf32>
    %215 = vector.shape_cast %214 : vector<8xf32> to vector<8x1xf32>
    %216 = tpu.reciprocal %215 {approx = true} : vector<8x1xf32> -> vector<8x1xf32>
    %217 = vector.broadcast %216 : vector<8x1xf32> to vector<8x8xf32>
    %218 = arith.mulf %213, %217 : vector<8x8xf32>
    %cst_77 = arith.constant dense<0.000000e+00> : vector<8x8xf32>
    %219 = tpu.matmul %218, %203, %cst_77 {dimension_numbers = #tpu.dot_dimension_numbers<[1], [0], [0], [1], [0, 0, 1, 1], [], []>} : vector<8x8xf32>, vector<8x8xf32>, vector<8x8xf32> -> vector<8x8xf32>
    %220 = vector.extract_strided_slice %200 {offsets = [0, 8], sizes = [8, 8], strides = [1, 1]} : vector<8x96xf32> to vector<8x8xf32>
    %221 = vector.extract_strided_slice %200 {offsets = [0, 40], sizes = [8, 8], strides = [1, 1]} : vector<8x96xf32> to vector<8x8xf32>
    %222 = vector.extract_strided_slice %200 {offsets = [0, 72], sizes = [8, 8], strides = [1, 1]} : vector<8x96xf32> to vector<8x8xf32>
    %cst_78 = arith.constant dense<0.000000e+00> : vector<8x8xf32>
    %223 = tpu.matmul %220, %221, %cst_78 {dimension_numbers = #tpu.dot_dimension_numbers<[1], [1], [0], [0], [0, 0, 1, 0], [], []>} : vector<8x8xf32>, vector<8x8xf32>, vector<8x8xf32> -> vector<8x8xf32>
    %cst_79 = arith.constant 0.353553385 : f32
    %224 = vector.broadcast %cst_79 : f32 to vector<8x8xf32>
    %225 = arith.mulf %223, %224 : vector<8x8xf32>
    %cst_80 = arith.constant -1.000000e+09 : f32
    %226 = vector.broadcast %cst_80 : f32 to vector<8x8xf32>
    %227 = arith.select %2, %225, %226 : vector<8x8xi1>, vector<8x8xf32>
    %cst_81 = arith.constant dense<0xFF800000> : vector<8xf32>
    %228 = vector.multi_reduction <maximumf>, %227, %cst_81 [1] : vector<8x8xf32> to vector<8xf32>
    %229 = vector.shape_cast %228 : vector<8xf32> to vector<8x1xf32>
    %230 = vector.broadcast %229 : vector<8x1xf32> to vector<8x8xf32>
    %231 = arith.subf %227, %230 : vector<8x8xf32>
    %232 = math.exp %231 : vector<8x8xf32>
    %cst_82 = arith.constant dense<0.000000e+00> : vector<8xf32>
    %233 = vector.multi_reduction <add>, %232, %cst_82 [1] : vector<8x8xf32> to vector<8xf32>
    %234 = vector.shape_cast %233 : vector<8xf32> to vector<8x1xf32>
    %235 = tpu.reciprocal %234 {approx = true} : vector<8x1xf32> -> vector<8x1xf32>
    %236 = vector.broadcast %235 : vector<8x1xf32> to vector<8x8xf32>
    %237 = arith.mulf %232, %236 : vector<8x8xf32>
    %cst_83 = arith.constant dense<0.000000e+00> : vector<8x8xf32>
    %238 = tpu.matmul %237, %222, %cst_83 {dimension_numbers = #tpu.dot_dimension_numbers<[1], [0], [0], [1], [0, 0, 1, 1], [], []>} : vector<8x8xf32>, vector<8x8xf32>, vector<8x8xf32> -> vector<8x8xf32>
    %239 = vector.extract_strided_slice %200 {offsets = [0, 16], sizes = [8, 8], strides = [1, 1]} : vector<8x96xf32> to vector<8x8xf32>
    %240 = vector.extract_strided_slice %200 {offsets = [0, 48], sizes = [8, 8], strides = [1, 1]} : vector<8x96xf32> to vector<8x8xf32>
    %241 = vector.extract_strided_slice %200 {offsets = [0, 80], sizes = [8, 8], strides = [1, 1]} : vector<8x96xf32> to vector<8x8xf32>
    %cst_84 = arith.constant dense<0.000000e+00> : vector<8x8xf32>
    %242 = tpu.matmul %239, %240, %cst_84 {dimension_numbers = #tpu.dot_dimension_numbers<[1], [1], [0], [0], [0, 0, 1, 0], [], []>} : vector<8x8xf32>, vector<8x8xf32>, vector<8x8xf32> -> vector<8x8xf32>
    %cst_85 = arith.constant 0.353553385 : f32
    %243 = vector.broadcast %cst_85 : f32 to vector<8x8xf32>
    %244 = arith.mulf %242, %243 : vector<8x8xf32>
    %cst_86 = arith.constant -1.000000e+09 : f32
    %245 = vector.broadcast %cst_86 : f32 to vector<8x8xf32>
    %246 = arith.select %2, %244, %245 : vector<8x8xi1>, vector<8x8xf32>
    %cst_87 = arith.constant dense<0xFF800000> : vector<8xf32>
    %247 = vector.multi_reduction <maximumf>, %246, %cst_87 [1] : vector<8x8xf32> to vector<8xf32>
    %248 = vector.shape_cast %247 : vector<8xf32> to vector<8x1xf32>
    %249 = vector.broadcast %248 : vector<8x1xf32> to vector<8x8xf32>
    %250 = arith.subf %246, %249 : vector<8x8xf32>
    %251 = math.exp %250 : vector<8x8xf32>
    %cst_88 = arith.constant dense<0.000000e+00> : vector<8xf32>
    %252 = vector.multi_reduction <add>, %251, %cst_88 [1] : vector<8x8xf32> to vector<8xf32>
    %253 = vector.shape_cast %252 : vector<8xf32> to vector<8x1xf32>
    %254 = tpu.reciprocal %253 {approx = true} : vector<8x1xf32> -> vector<8x1xf32>
    %255 = vector.broadcast %254 : vector<8x1xf32> to vector<8x8xf32>
    %256 = arith.mulf %251, %255 : vector<8x8xf32>
    %cst_89 = arith.constant dense<0.000000e+00> : vector<8x8xf32>
    %257 = tpu.matmul %256, %241, %cst_89 {dimension_numbers = #tpu.dot_dimension_numbers<[1], [0], [0], [1], [0, 0, 1, 1], [], []>} : vector<8x8xf32>, vector<8x8xf32>, vector<8x8xf32> -> vector<8x8xf32>
    %258 = vector.extract_strided_slice %200 {offsets = [0, 24], sizes = [8, 8], strides = [1, 1]} : vector<8x96xf32> to vector<8x8xf32>
    %259 = vector.extract_strided_slice %200 {offsets = [0, 56], sizes = [8, 8], strides = [1, 1]} : vector<8x96xf32> to vector<8x8xf32>
    %260 = vector.extract_strided_slice %200 {offsets = [0, 88], sizes = [8, 8], strides = [1, 1]} : vector<8x96xf32> to vector<8x8xf32>
    %cst_90 = arith.constant dense<0.000000e+00> : vector<8x8xf32>
    %261 = tpu.matmul %258, %259, %cst_90 {dimension_numbers = #tpu.dot_dimension_numbers<[1], [1], [0], [0], [0, 0, 1, 0], [], []>} : vector<8x8xf32>, vector<8x8xf32>, vector<8x8xf32> -> vector<8x8xf32>
    %cst_91 = arith.constant 0.353553385 : f32
    %262 = vector.broadcast %cst_91 : f32 to vector<8x8xf32>
    %263 = arith.mulf %261, %262 : vector<8x8xf32>
    %cst_92 = arith.constant -1.000000e+09 : f32
    %264 = vector.broadcast %cst_92 : f32 to vector<8x8xf32>
    %265 = arith.select %2, %263, %264 : vector<8x8xi1>, vector<8x8xf32>
    %cst_93 = arith.constant dense<0xFF800000> : vector<8xf32>
    %266 = vector.multi_reduction <maximumf>, %265, %cst_93 [1] : vector<8x8xf32> to vector<8xf32>
    %267 = vector.shape_cast %266 : vector<8xf32> to vector<8x1xf32>
    %268 = vector.broadcast %267 : vector<8x1xf32> to vector<8x8xf32>
    %269 = arith.subf %265, %268 : vector<8x8xf32>
    %270 = math.exp %269 : vector<8x8xf32>
    %cst_94 = arith.constant dense<0.000000e+00> : vector<8xf32>
    %271 = vector.multi_reduction <add>, %270, %cst_94 [1] : vector<8x8xf32> to vector<8xf32>
    %272 = vector.shape_cast %271 : vector<8xf32> to vector<8x1xf32>
    %273 = tpu.reciprocal %272 {approx = true} : vector<8x1xf32> -> vector<8x1xf32>
    %274 = vector.broadcast %273 : vector<8x1xf32> to vector<8x8xf32>
    %275 = arith.mulf %270, %274 : vector<8x8xf32>
    %cst_95 = arith.constant dense<0.000000e+00> : vector<8x8xf32>
    %276 = tpu.matmul %275, %260, %cst_95 {dimension_numbers = #tpu.dot_dimension_numbers<[1], [0], [0], [1], [0, 0, 1, 1], [], []>} : vector<8x8xf32>, vector<8x8xf32>, vector<8x8xf32> -> vector<8x8xf32>
    %277 = tpu.concatenate %219, %238, %257, %276 in 1 : vector<8x8xf32>, vector<8x8xf32>, vector<8x8xf32>, vector<8x8xf32> -> vector<8x32xf32>
    %278 = vector.extract_strided_slice %199 {offsets = [8, 0], sizes = [8, 96], strides = [1, 1]} : vector<16x96xf32> to vector<8x96xf32>
    %279 = vector.extract_strided_slice %278 {offsets = [0, 0], sizes = [8, 8], strides = [1, 1]} : vector<8x96xf32> to vector<8x8xf32>
    %280 = vector.extract_strided_slice %278 {offsets = [0, 32], sizes = [8, 8], strides = [1, 1]} : vector<8x96xf32> to vector<8x8xf32>
    %281 = vector.extract_strided_slice %278 {offsets = [0, 64], sizes = [8, 8], strides = [1, 1]} : vector<8x96xf32> to vector<8x8xf32>
    %cst_96 = arith.constant dense<0.000000e+00> : vector<8x8xf32>
    %282 = tpu.matmul %279, %280, %cst_96 {dimension_numbers = #tpu.dot_dimension_numbers<[1], [1], [0], [0], [0, 0, 1, 0], [], []>} : vector<8x8xf32>, vector<8x8xf32>, vector<8x8xf32> -> vector<8x8xf32>
    %cst_97 = arith.constant 0.353553385 : f32
    %283 = vector.broadcast %cst_97 : f32 to vector<8x8xf32>
    %284 = arith.mulf %282, %283 : vector<8x8xf32>
    %cst_98 = arith.constant -1.000000e+09 : f32
    %285 = vector.broadcast %cst_98 : f32 to vector<8x8xf32>
    %286 = arith.select %2, %284, %285 : vector<8x8xi1>, vector<8x8xf32>
    %cst_99 = arith.constant dense<0xFF800000> : vector<8xf32>
    %287 = vector.multi_reduction <maximumf>, %286, %cst_99 [1] : vector<8x8xf32> to vector<8xf32>
    %288 = vector.shape_cast %287 : vector<8xf32> to vector<8x1xf32>
    %289 = vector.broadcast %288 : vector<8x1xf32> to vector<8x8xf32>
    %290 = arith.subf %286, %289 : vector<8x8xf32>
    %291 = math.exp %290 : vector<8x8xf32>
    %cst_100 = arith.constant dense<0.000000e+00> : vector<8xf32>
    %292 = vector.multi_reduction <add>, %291, %cst_100 [1] : vector<8x8xf32> to vector<8xf32>
    %293 = vector.shape_cast %292 : vector<8xf32> to vector<8x1xf32>
    %294 = tpu.reciprocal %293 {approx = true} : vector<8x1xf32> -> vector<8x1xf32>
    %295 = vector.broadcast %294 : vector<8x1xf32> to vector<8x8xf32>
    %296 = arith.mulf %291, %295 : vector<8x8xf32>
    %cst_101 = arith.constant dense<0.000000e+00> : vector<8x8xf32>
    %297 = tpu.matmul %296, %281, %cst_101 {dimension_numbers = #tpu.dot_dimension_numbers<[1], [0], [0], [1], [0, 0, 1, 1], [], []>} : vector<8x8xf32>, vector<8x8xf32>, vector<8x8xf32> -> vector<8x8xf32>
    %298 = vector.extract_strided_slice %278 {offsets = [0, 8], sizes = [8, 8], strides = [1, 1]} : vector<8x96xf32> to vector<8x8xf32>
    %299 = vector.extract_strided_slice %278 {offsets = [0, 40], sizes = [8, 8], strides = [1, 1]} : vector<8x96xf32> to vector<8x8xf32>
    %300 = vector.extract_strided_slice %278 {offsets = [0, 72], sizes = [8, 8], strides = [1, 1]} : vector<8x96xf32> to vector<8x8xf32>
    %cst_102 = arith.constant dense<0.000000e+00> : vector<8x8xf32>
    %301 = tpu.matmul %298, %299, %cst_102 {dimension_numbers = #tpu.dot_dimension_numbers<[1], [1], [0], [0], [0, 0, 1, 0], [], []>} : vector<8x8xf32>, vector<8x8xf32>, vector<8x8xf32> -> vector<8x8xf32>
    %cst_103 = arith.constant 0.353553385 : f32
    %302 = vector.broadcast %cst_103 : f32 to vector<8x8xf32>
    %303 = arith.mulf %301, %302 : vector<8x8xf32>
    %cst_104 = arith.constant -1.000000e+09 : f32
    %304 = vector.broadcast %cst_104 : f32 to vector<8x8xf32>
    %305 = arith.select %2, %303, %304 : vector<8x8xi1>, vector<8x8xf32>
    %cst_105 = arith.constant dense<0xFF800000> : vector<8xf32>
    %306 = vector.multi_reduction <maximumf>, %305, %cst_105 [1] : vector<8x8xf32> to vector<8xf32>
    %307 = vector.shape_cast %306 : vector<8xf32> to vector<8x1xf32>
    %308 = vector.broadcast %307 : vector<8x1xf32> to vector<8x8xf32>
    %309 = arith.subf %305, %308 : vector<8x8xf32>
    %310 = math.exp %309 : vector<8x8xf32>
    %cst_106 = arith.constant dense<0.000000e+00> : vector<8xf32>
    %311 = vector.multi_reduction <add>, %310, %cst_106 [1] : vector<8x8xf32> to vector<8xf32>
    %312 = vector.shape_cast %311 : vector<8xf32> to vector<8x1xf32>
    %313 = tpu.reciprocal %312 {approx = true} : vector<8x1xf32> -> vector<8x1xf32>
    %314 = vector.broadcast %313 : vector<8x1xf32> to vector<8x8xf32>
    %315 = arith.mulf %310, %314 : vector<8x8xf32>
    %cst_107 = arith.constant dense<0.000000e+00> : vector<8x8xf32>
    %316 = tpu.matmul %315, %300, %cst_107 {dimension_numbers = #tpu.dot_dimension_numbers<[1], [0], [0], [1], [0, 0, 1, 1], [], []>} : vector<8x8xf32>, vector<8x8xf32>, vector<8x8xf32> -> vector<8x8xf32>
    %317 = vector.extract_strided_slice %278 {offsets = [0, 16], sizes = [8, 8], strides = [1, 1]} : vector<8x96xf32> to vector<8x8xf32>
    %318 = vector.extract_strided_slice %278 {offsets = [0, 48], sizes = [8, 8], strides = [1, 1]} : vector<8x96xf32> to vector<8x8xf32>
    %319 = vector.extract_strided_slice %278 {offsets = [0, 80], sizes = [8, 8], strides = [1, 1]} : vector<8x96xf32> to vector<8x8xf32>
    %cst_108 = arith.constant dense<0.000000e+00> : vector<8x8xf32>
    %320 = tpu.matmul %317, %318, %cst_108 {dimension_numbers = #tpu.dot_dimension_numbers<[1], [1], [0], [0], [0, 0, 1, 0], [], []>} : vector<8x8xf32>, vector<8x8xf32>, vector<8x8xf32> -> vector<8x8xf32>
    %cst_109 = arith.constant 0.353553385 : f32
    %321 = vector.broadcast %cst_109 : f32 to vector<8x8xf32>
    %322 = arith.mulf %320, %321 : vector<8x8xf32>
    %cst_110 = arith.constant -1.000000e+09 : f32
    %323 = vector.broadcast %cst_110 : f32 to vector<8x8xf32>
    %324 = arith.select %2, %322, %323 : vector<8x8xi1>, vector<8x8xf32>
    %cst_111 = arith.constant dense<0xFF800000> : vector<8xf32>
    %325 = vector.multi_reduction <maximumf>, %324, %cst_111 [1] : vector<8x8xf32> to vector<8xf32>
    %326 = vector.shape_cast %325 : vector<8xf32> to vector<8x1xf32>
    %327 = vector.broadcast %326 : vector<8x1xf32> to vector<8x8xf32>
    %328 = arith.subf %324, %327 : vector<8x8xf32>
    %329 = math.exp %328 : vector<8x8xf32>
    %cst_112 = arith.constant dense<0.000000e+00> : vector<8xf32>
    %330 = vector.multi_reduction <add>, %329, %cst_112 [1] : vector<8x8xf32> to vector<8xf32>
    %331 = vector.shape_cast %330 : vector<8xf32> to vector<8x1xf32>
    %332 = tpu.reciprocal %331 {approx = true} : vector<8x1xf32> -> vector<8x1xf32>
    %333 = vector.broadcast %332 : vector<8x1xf32> to vector<8x8xf32>
    %334 = arith.mulf %329, %333 : vector<8x8xf32>
    %cst_113 = arith.constant dense<0.000000e+00> : vector<8x8xf32>
    %335 = tpu.matmul %334, %319, %cst_113 {dimension_numbers = #tpu.dot_dimension_numbers<[1], [0], [0], [1], [0, 0, 1, 1], [], []>} : vector<8x8xf32>, vector<8x8xf32>, vector<8x8xf32> -> vector<8x8xf32>
    %336 = vector.extract_strided_slice %278 {offsets = [0, 24], sizes = [8, 8], strides = [1, 1]} : vector<8x96xf32> to vector<8x8xf32>
    %337 = vector.extract_strided_slice %278 {offsets = [0, 56], sizes = [8, 8], strides = [1, 1]} : vector<8x96xf32> to vector<8x8xf32>
    %338 = vector.extract_strided_slice %278 {offsets = [0, 88], sizes = [8, 8], strides = [1, 1]} : vector<8x96xf32> to vector<8x8xf32>
    %cst_114 = arith.constant dense<0.000000e+00> : vector<8x8xf32>
    %339 = tpu.matmul %336, %337, %cst_114 {dimension_numbers = #tpu.dot_dimension_numbers<[1], [1], [0], [0], [0, 0, 1, 0], [], []>} : vector<8x8xf32>, vector<8x8xf32>, vector<8x8xf32> -> vector<8x8xf32>
    %cst_115 = arith.constant 0.353553385 : f32
    %340 = vector.broadcast %cst_115 : f32 to vector<8x8xf32>
    %341 = arith.mulf %339, %340 : vector<8x8xf32>
    %cst_116 = arith.constant -1.000000e+09 : f32
    %342 = vector.broadcast %cst_116 : f32 to vector<8x8xf32>
    %343 = arith.select %2, %341, %342 : vector<8x8xi1>, vector<8x8xf32>
    %cst_117 = arith.constant dense<0xFF800000> : vector<8xf32>
    %344 = vector.multi_reduction <maximumf>, %343, %cst_117 [1] : vector<8x8xf32> to vector<8xf32>
    %345 = vector.shape_cast %344 : vector<8xf32> to vector<8x1xf32>
    %346 = vector.broadcast %345 : vector<8x1xf32> to vector<8x8xf32>
    %347 = arith.subf %343, %346 : vector<8x8xf32>
    %348 = math.exp %347 : vector<8x8xf32>
    %cst_118 = arith.constant dense<0.000000e+00> : vector<8xf32>
    %349 = vector.multi_reduction <add>, %348, %cst_118 [1] : vector<8x8xf32> to vector<8xf32>
    %350 = vector.shape_cast %349 : vector<8xf32> to vector<8x1xf32>
    %351 = tpu.reciprocal %350 {approx = true} : vector<8x1xf32> -> vector<8x1xf32>
    %352 = vector.broadcast %351 : vector<8x1xf32> to vector<8x8xf32>
    %353 = arith.mulf %348, %352 : vector<8x8xf32>
    %cst_119 = arith.constant dense<0.000000e+00> : vector<8x8xf32>
    %354 = tpu.matmul %353, %338, %cst_119 {dimension_numbers = #tpu.dot_dimension_numbers<[1], [0], [0], [1], [0, 0, 1, 1], [], []>} : vector<8x8xf32>, vector<8x8xf32>, vector<8x8xf32> -> vector<8x8xf32>
    %355 = tpu.concatenate %297, %316, %335, %354 in 1 : vector<8x8xf32>, vector<8x8xf32>, vector<8x8xf32>, vector<8x8xf32> -> vector<8x32xf32>
    %356 = tpu.concatenate %277, %355 in 0 : vector<8x32xf32>, vector<8x32xf32> -> vector<16x32xf32>
    %c0_120 = arith.constant 0 : index
    %c0_121 = arith.constant 0 : index
    %357 = vector.load %arg7[%c0_120, %c0_121] : memref<32x32xf32, #tpu.memory_space<vmem>>, vector<32x32xf32>
    %cst_122 = arith.constant dense<0.000000e+00> : vector<16x32xf32>
    %358 = tpu.matmul %356, %357, %cst_122 {dimension_numbers = #tpu.dot_dimension_numbers<[1], [0], [0], [1], [0, 0, 1, 1], [], []>} : vector<16x32xf32>, vector<32x32xf32>, vector<16x32xf32> -> vector<16x32xf32>
    %c0_123 = arith.constant 0 : index
    %c0_124 = arith.constant 0 : index
    %359 = vector.load %arg8[%c0_123, %c0_124] : memref<1x32xf32, #tpu.memory_space<vmem>>, vector<1x32xf32>
    %360 = vector.broadcast %359 : vector<1x32xf32> to vector<16x32xf32>
    %361 = arith.addf %358, %360 : vector<16x32xf32>
    %cst_125 = arith.constant dense<0.000000e+00> : vector<16xf32>
    %362 = vector.multi_reduction <add>, %361, %cst_125 [1] : vector<16x32xf32> to vector<16xf32>
    %363 = vector.shape_cast %362 : vector<16xf32> to vector<16x1xf32>
    %cst_126 = arith.constant 3.200000e+01 : f32
    %364 = vector.broadcast %cst_126 : f32 to vector<16x1xf32>
    %365 = arith.divf %363, %364 : vector<16x1xf32>
    %366 = vector.broadcast %365 : vector<16x1xf32> to vector<16x32xf32>
    %367 = arith.subf %361, %366 : vector<16x32xf32>
    %368 = arith.mulf %367, %367 : vector<16x32xf32>
    %cst_127 = arith.constant dense<0.000000e+00> : vector<16xf32>
    %369 = vector.multi_reduction <add>, %368, %cst_127 [1] : vector<16x32xf32> to vector<16xf32>
    %370 = vector.shape_cast %369 : vector<16xf32> to vector<16x1xf32>
    %cst_128 = arith.constant 3.200000e+01 : f32
    %371 = vector.broadcast %cst_128 : f32 to vector<16x1xf32>
    %372 = arith.divf %370, %371 : vector<16x1xf32>
    %373 = vector.broadcast %365 : vector<16x1xf32> to vector<16x32xf32>
    %374 = arith.subf %361, %373 : vector<16x32xf32>
    %cst_129 = arith.constant 9.99999974E-6 : f32
    %375 = vector.broadcast %cst_129 : f32 to vector<16x1xf32>
    %376 = arith.addf %372, %375 : vector<16x1xf32>
    %377 = math.rsqrt %376 : vector<16x1xf32>
    %378 = vector.broadcast %377 : vector<16x1xf32> to vector<16x32xf32>
    %379 = arith.mulf %374, %378 : vector<16x32xf32>
    %380 = vector.broadcast %3 : vector<1x32xf32> to vector<16x32xf32>
    %381 = arith.mulf %379, %380 : vector<16x32xf32>
    %382 = vector.broadcast %4 : vector<1x32xf32> to vector<16x32xf32>
    %383 = arith.addf %381, %382 : vector<16x32xf32>
    %c0_130 = arith.constant 0 : index
    %c0_131 = arith.constant 0 : index
    %384 = vector.load %arg15[%c0_130, %c0_131] : memref<1x32xf32, #tpu.memory_space<vmem>>, vector<1x32xf32>
    %c0_132 = arith.constant 0 : index
    %c0_133 = arith.constant 0 : index
    %385 = vector.load %arg16[%c0_132, %c0_133] : memref<1x32xf32, #tpu.memory_space<vmem>>, vector<1x32xf32>
    %c0_134 = arith.constant 0 : index
    %c0_135 = arith.constant 0 : index
    %386 = vector.load %arg11[%c0_134, %c0_135] : memref<32x32xf32, #tpu.memory_space<vmem>>, vector<32x32xf32>
    %cst_136 = arith.constant dense<0.000000e+00> : vector<16x32xf32>
    %387 = tpu.matmul %383, %386, %cst_136 {dimension_numbers = #tpu.dot_dimension_numbers<[1], [0], [0], [1], [0, 0, 1, 1], [], []>} : vector<16x32xf32>, vector<32x32xf32>, vector<16x32xf32> -> vector<16x32xf32>
    %c0_137 = arith.constant 0 : index
    %c0_138 = arith.constant 0 : index
    %388 = vector.load %arg12[%c0_137, %c0_138] : memref<1x32xf32, #tpu.memory_space<vmem>>, vector<1x32xf32>
    %389 = vector.broadcast %388 : vector<1x32xf32> to vector<16x32xf32>
    %390 = arith.addf %387, %389 : vector<16x32xf32>
    %cst_139 = arith.constant 0.000000e+00 : f32
    %391 = vector.broadcast %cst_139 : f32 to vector<16x32xf32>
    %392 = arith.maximumf %390, %391 : vector<16x32xf32>
    %cst_140 = arith.constant dense<0.000000e+00> : vector<16xf32>
    %393 = vector.multi_reduction <add>, %392, %cst_140 [1] : vector<16x32xf32> to vector<16xf32>
    %394 = vector.shape_cast %393 : vector<16xf32> to vector<16x1xf32>
    %cst_141 = arith.constant 3.200000e+01 : f32
    %395 = vector.broadcast %cst_141 : f32 to vector<16x1xf32>
    %396 = arith.divf %394, %395 : vector<16x1xf32>
    %397 = vector.broadcast %396 : vector<16x1xf32> to vector<16x32xf32>
    %398 = arith.subf %392, %397 : vector<16x32xf32>
    %399 = arith.mulf %398, %398 : vector<16x32xf32>
    %cst_142 = arith.constant dense<0.000000e+00> : vector<16xf32>
    %400 = vector.multi_reduction <add>, %399, %cst_142 [1] : vector<16x32xf32> to vector<16xf32>
    %401 = vector.shape_cast %400 : vector<16xf32> to vector<16x1xf32>
    %cst_143 = arith.constant 3.200000e+01 : f32
    %402 = vector.broadcast %cst_143 : f32 to vector<16x1xf32>
    %403 = arith.divf %401, %402 : vector<16x1xf32>
    %404 = vector.broadcast %396 : vector<16x1xf32> to vector<16x32xf32>
    %405 = arith.subf %392, %404 : vector<16x32xf32>
    %cst_144 = arith.constant 9.99999974E-6 : f32
    %406 = vector.broadcast %cst_144 : f32 to vector<16x1xf32>
    %407 = arith.addf %403, %406 : vector<16x1xf32>
    %408 = math.rsqrt %407 : vector<16x1xf32>
    %409 = vector.broadcast %408 : vector<16x1xf32> to vector<16x32xf32>
    %410 = arith.mulf %405, %409 : vector<16x32xf32>
    %411 = vector.broadcast %384 : vector<1x32xf32> to vector<16x32xf32>
    %412 = arith.mulf %410, %411 : vector<16x32xf32>
    %413 = vector.broadcast %385 : vector<1x32xf32> to vector<16x32xf32>
    %414 = arith.addf %412, %413 : vector<16x32xf32>
    %c0_145 = arith.constant 0 : index
    %c0_146 = arith.constant 0 : index
    %415 = vector.load %arg13[%c0_145, %c0_146] : memref<32x32xf32, #tpu.memory_space<vmem>>, vector<32x32xf32>
    %cst_147 = arith.constant dense<0.000000e+00> : vector<16x32xf32>
    %416 = tpu.matmul %414, %415, %cst_147 {dimension_numbers = #tpu.dot_dimension_numbers<[1], [0], [0], [1], [0, 0, 1, 1], [], []>} : vector<16x32xf32>, vector<32x32xf32>, vector<16x32xf32> -> vector<16x32xf32>
    %c0_148 = arith.constant 0 : index
    %c0_149 = arith.constant 0 : index
    %417 = vector.load %arg14[%c0_148, %c0_149] : memref<1x32xf32, #tpu.memory_space<vmem>>, vector<1x32xf32>
    %418 = vector.broadcast %417 : vector<1x32xf32> to vector<16x32xf32>
    %419 = arith.addf %416, %418 : vector<16x32xf32>
    %cst_150 = arith.constant 0.000000e+00 : f32
    %420 = vector.broadcast %cst_150 : f32 to vector<16x32xf32>
    %421 = arith.maximumf %419, %420 : vector<16x32xf32>
    %cst_151 = arith.constant dense<0.000000e+00> : vector<16xf32>
    %422 = vector.multi_reduction <add>, %421, %cst_151 [1] : vector<16x32xf32> to vector<16xf32>
    %423 = vector.shape_cast %422 : vector<16xf32> to vector<16x1xf32>
    %cst_152 = arith.constant 3.200000e+01 : f32
    %424 = vector.broadcast %cst_152 : f32 to vector<16x1xf32>
    %425 = arith.divf %423, %424 : vector<16x1xf32>
    %426 = vector.broadcast %425 : vector<16x1xf32> to vector<16x32xf32>
    %427 = arith.subf %421, %426 : vector<16x32xf32>
    %428 = arith.mulf %427, %427 : vector<16x32xf32>
    %cst_153 = arith.constant dense<0.000000e+00> : vector<16xf32>
    %429 = vector.multi_reduction <add>, %428, %cst_153 [1] : vector<16x32xf32> to vector<16xf32>
    %430 = vector.shape_cast %429 : vector<16xf32> to vector<16x1xf32>
    %cst_154 = arith.constant 3.200000e+01 : f32
    %431 = vector.broadcast %cst_154 : f32 to vector<16x1xf32>
    %432 = arith.divf %430, %431 : vector<16x1xf32>
    %433 = vector.broadcast %425 : vector<16x1xf32> to vector<16x32xf32>
    %434 = arith.subf %421, %433 : vector<16x32xf32>
    %cst_155 = arith.constant 9.99999974E-6 : f32
    %435 = vector.broadcast %cst_155 : f32 to vector<16x1xf32>
    %436 = arith.addf %432, %435 : vector<16x1xf32>
    %437 = math.rsqrt %436 : vector<16x1xf32>
    %438 = vector.broadcast %437 : vector<16x1xf32> to vector<16x32xf32>
    %439 = arith.mulf %434, %438 : vector<16x32xf32>
    %440 = vector.broadcast %384 : vector<1x32xf32> to vector<16x32xf32>
    %441 = arith.mulf %439, %440 : vector<16x32xf32>
    %442 = vector.broadcast %385 : vector<1x32xf32> to vector<16x32xf32>
    %443 = arith.addf %441, %442 : vector<16x32xf32>
    %c0_156 = arith.constant 0 : index
    %c0_157 = arith.constant 0 : index
    %444 = vector.load %arg17[%c0_156, %c0_157] : memref<16x32xf32, #tpu.memory_space<vmem>>, vector<16x32xf32>
    tpu.vector_store %arg17[%c0_156, %c0_157], %443 {strides = array<i32>} : memref<16x32xf32, #tpu.memory_space<vmem>>, vector<16x32xf32>,
    return
  }
}

</mosaic_0001>

<bundles_post_ra>
// kernel: block_forward.1
= control target key start
LH: loop header
LB: loop body
LE: loop exit
PB: predicated region body
PF: predicated region fallthrough
CT: control target
= control target key end

     0   :  { %s5033_s0 = inlined_call_operand.hbm [shape: f32[16,32], index: 0, kind: input, shape index: {}]   ;;  %s5034_s1 = inlined_call_operand.hbm [shape: f32[32,96], index: 1, kind: input, shape index: {}]   ;;  %s5035_s2 = inlined_call_operand.vmem [shape: f32[1,96], index: 2, kind: input, shape index: {}]   ;;  %s5036_s3 = inlined_call_operand.hbm [shape: f32[32,32], index: 3, kind: input, shape index: {}]   ;;  %s5037_s4 = inlined_call_operand.vmem [shape: f32[1,32], index: 4, kind: input, shape index: {}]   ;;  %s5038_s5 = inlined_call_operand.hbm [shape: f32[32,96], index: 5, kind: input, shape index: {}]   ;;  %s5039_s6 = inlined_call_operand.vmem [shape: f32[1,96], index: 6, kind: input, shape index: {}]   ;;  %s5040_s7 = inlined_call_operand.hbm [shape: f32[32,32], index: 7, kind: input, shape index: {}]   ;;  %s5041_s8 = inlined_call_operand.vmem [shape: f32[1,32], index: 8, kind: input, shape index: {}]   ;;  %s5042_s9 = inlined_call_operand.vmem [shape: f32[1,32], index: 9, kind: input, shape index: {}]   ;;  %s5043_s10 = inlined_call_operand.vmem [shape: f32[1,32], index: 10, kind: input, shape index: {}]   ;;  %s5044_s11 = inlined_call_operand.vmem [shape: f32[32,32], index: 11, kind: input, shape index: {}]   ;;  %s5045_s12 = inlined_call_operand.vmem [shape: f32[1,32], index: 12, kind: input, shape index: {}]   ;;  %s5046_s13 = inlined_call_operand.hbm [shape: f32[32,32], index: 13, kind: input, shape index: {}]   ;;  %s5047_s14 = inlined_call_operand.vmem [shape: f32[1,32], index: 14, kind: input, shape index: {}]   ;;  %s5048_s15 = inlined_call_operand.vmem [shape: f32[1,32], index: 15, kind: input, shape index: {}]   ;;  %s5049_s16 = inlined_call_operand.vmem [shape: f32[1,32], index: 16, kind: input, shape index: {}]   ;;  %s5050_s17 = inlined_call_operand.hbm [shape: f32[16,32], index: 17, kind: output, shape index: {}]  }
   0x1   :  { %5054 = sst [smem:[#allocation19_spill]] %s5033_s0 }
   0x2   :  { %5055 = sst [smem:[#allocation20_spill]] %s5034_s1 }
   0x3   :  { %5056 = sst [smem:[#allocation21_spill]] %s5047_s14 }
   0x4   :  { %5057 = sst [smem:[#allocation22_spill]] %s5050_s17 }
   0x5   :  { %22 = vsyncpa [#allocation3], 0 }
   0x6   :  { %23 = vsyncpa [#allocation6], 0 }
   0x7   :  { %24 = vsyncpa [#allocation9], 0 }
   0x8   :  { %25 = vsyncpa [#allocation12], 0 }
   0x9   :  { %26 = vsyncpa [#allocation4], 0  ;;  %s4317_s24 = smov [#allocation5]   ;;  %s4318_s26 = smov [#allocation8]  }
   0xa   :  { %s44_s25 = sshll.u32 %s4317_s24, 4  ;;  %s72_s27 = sshll.u32 %s4318_s26, 4  ;;  %s45_s25 = int_to_ptr.vmem [resolvable:$true] %s44_s25  ;;  %s4431_s27 = int_to_ptr.vmem [resolvable:$true] %s72_s27 }
   0xb   :  { %s5058_s0 = sld [smem:[#allocation20_spill]] }
  0x11   :  { %s4153_s30 = scalar_lea.hbm %s5058_s0, 512 }
  0x12   :  { %p4154_p0 = scmp.ne.s32.totalorder %s5058_s0, %s4153_s30  ;;  %p4157_p1 = scmp.lt.u32.totalorder %s4153_s30, %s5058_s0 }
  0x14   :  { %p4159_p2 = pnand %p4157_p1, %p4154_p0 }
  0x16   :  { %4162 = shalt.err (!%p4159_p2)
}
  0x17   :  { %s4163_s21 = scalar_lea.vmem %s45_s25, 512  ;;  %p4168_p4 = scmp.lt.s32.totalorder %s45_s25, %s45_s25 }
  0x18   :  { %p4164_p3 = scmp.ne.s32.totalorder %s45_s25, %s4163_s21  ;;  %p4169_p5 = scmp.lt.s32.totalorder %s4163_s21, %s4163_s21 }
  0x1a   :  { %p4170_p6 = por %p4169_p5, %p4168_p4 }
  0x1c   :  { %p4171_p7 = pnand %p4170_p6, %p4164_p3 }
  0x1e   :  { %4174 = shalt.err (!%p4171_p7)
}
  0x1f   :  { %s4319_s22 = smov 128   ;;  %s4320_s23 = smov 8  }
  0x20   :  { %50 = dma.hbm_to_vmem [thread:$0]  %s5058_s0, 512, %s45_s25, [#allocation6], %s4319_s22, %s4319_s22, %s4320_s23  }
  0x21   :  { %s4175_s30 = scalar_lea.hbm %s5038_s5, 512 }
  0x22   :  { %p4176_p8 = scmp.ne.s32.totalorder %s5038_s5, %s4175_s30  ;;  %p4179_p9 = scmp.lt.u32.totalorder %s4175_s30, %s5038_s5 }
  0x24   :  { %p4181_p10 = pnand %p4179_p9, %p4176_p8 }
  0x26   :  { %4184 = shalt.err (!%p4181_p10)
}
  0x27   :  { %s4185_s21 = scalar_lea.vmem %s4431_s27, 512  ;;  %p4190_p12 = scmp.lt.s32.totalorder %s4431_s27, %s4431_s27 }
  0x28   :  { %p4186_p11 = scmp.ne.s32.totalorder %s4431_s27, %s4185_s21  ;;  %p4191_p13 = scmp.lt.s32.totalorder %s4185_s21, %s4185_s21 }
  0x2a   :  { %p4192_p0 = por %p4191_p13, %p4190_p12 }
  0x2c   :  { %p4193_p1 = pnand %p4192_p0, %p4186_p11 }
  0x2e   :  { %4196 = shalt.err (!%p4193_p1)
}
  0x2f   :  { %78 = dma.hbm_to_vmem [thread:$0]  %s5038_s5, 512, %s4431_s27, [#allocation9], %s4319_s22, %s4319_s22, %s4320_s23  }
  0x30   :  { %s4321_s24 = smov [#allocation2]   ;;  %s4322_s28 = smov [#allocation7]  }
  0x31   :  { %s32_s26 = sshll.u32 %s4321_s24, 4  ;;  %s58_s29 = sshll.u32 %s4322_s28, 4  ;;  %s33_s26 = int_to_ptr.vmem [resolvable:$true] %s32_s26  ;;  %s4468_s29 = int_to_ptr.vmem [resolvable:$true] %s58_s29 }
  0x32   :  { %s5059_s19 = sld [smem:[#allocation19_spill]] }
  0x38   :  { %s4197_s1 = scalar_lea.hbm %s5059_s19, 256 }
  0x39   :  { %p4198_p2 = scmp.ne.s32.totalorder %s5059_s19, %s4197_s1  ;;  %p4201_p3 = scmp.lt.u32.totalorder %s4197_s1, %s5059_s19 }
  0x3b   :  { %p4203_p4 = pnand %p4201_p3, %p4198_p2 }
  0x3d   :  { %4206 = shalt.err (!%p4203_p4)
}
  0x3e   :  { %s4207_s5 = scalar_lea.vmem %s33_s26, 256  ;;  %p4212_p6 = scmp.lt.s32.totalorder %s33_s26, %s33_s26 }
  0x3f   :  { %p4208_p5 = scmp.ne.s32.totalorder %s33_s26, %s4207_s5  ;;  %p4213_p7 = scmp.lt.s32.totalorder %s4207_s5, %s4207_s5 }
  0x41   :  { %p4214_p8 = por %p4213_p7, %p4212_p6 }
  0x43   :  { %p4215_p9 = pnand %p4214_p8, %p4208_p5 }
  0x45   :  { %4218 = shalt.err (!%p4215_p9)
}
  0x46   :  { %38 = dma.hbm_to_vmem [thread:$0]  %s5059_s19, 256, %s33_s26, [#allocation3], %s4319_s22, %s4319_s22, %s4320_s23  }
  0x47   :  { %s4219_s14 = scalar_lea.hbm %s5036_s3, 512 }
  0x48   :  { %p4220_p10 = scmp.ne.s32.totalorder %s5036_s3, %s4219_s14  ;;  %p4223_p11 = scmp.lt.u32.totalorder %s4219_s14, %s5036_s3 }
  0x4a   :  { %p4225_p12 = pnand %p4223_p11, %p4220_p10 }
  0x4c   :  { %4228 = shalt.err (!%p4225_p12)
}
  0x4d   :  { %s4229_s1 = scalar_lea.vmem %s4468_s29, 512  ;;  %p4234_p0 = scmp.lt.s32.totalorder %s4468_s29, %s4468_s29 }
  0x4e   :  { %p4230_p13 = scmp.ne.s32.totalorder %s4468_s29, %s4229_s1  ;;  %p4235_p1 = scmp.lt.s32.totalorder %s4229_s1, %s4229_s1 }
  0x50   :  { %p4236_p2 = por %p4235_p1, %p4234_p0 }
  0x52   :  { %p4237_p3 = pnand %p4236_p2, %p4230_p13 }
  0x54   :  { %4240 = shalt.err (!%p4237_p3)
}
  0x55   :  { %64 = dma.hbm_to_vmem [thread:$0]  %s5036_s3, 512, %s4468_s29, [#allocation6], %s4319_s22, %s4319_s22, %s4320_s23  }
  0x56   :  { %s4323_s20 = smov [#allocation10]   ;;  %s4324_s5 = smov [#allocation11]  }
  0x57   :  { %s86_s21 = sshll.u32 %s4323_s20, 4  ;;  %s108_s27 = sshll.u32 %s4324_s5, 4  ;;  %s87_s21 = int_to_ptr.vmem [resolvable:$true] %s86_s21  ;;  %s4505_s27 = int_to_ptr.vmem [resolvable:$true] %s108_s27 }
  0x58   :  { %s4241_s24 = scalar_lea.hbm %s5040_s7, 512 }
  0x59   :  { %p4242_p4 = scmp.ne.s32.totalorder %s5040_s7, %s4241_s24  ;;  %p4245_p5 = scmp.lt.u32.totalorder %s4241_s24, %s5040_s7 }
  0x5b   :  { %p4247_p6 = pnand %p4245_p5, %p4242_p4 }
  0x5d   :  { %4250 = shalt.err (!%p4247_p6)
}
  0x5e   :  { %s4251_s3 = scalar_lea.vmem %s87_s21, 512  ;;  %p4256_p8 = scmp.lt.s32.totalorder %s87_s21, %s87_s21 }
  0x5f   :  { %p4252_p7 = scmp.ne.s32.totalorder %s87_s21, %s4251_s3  ;;  %p4257_p9 = scmp.lt.s32.totalorder %s4251_s3, %s4251_s3 }
  0x61   :  { %p4258_p10 = por %p4257_p9, %p4256_p8 }
  0x63   :  { %p4259_p11 = pnand %p4258_p10, %p4252_p7 }
  0x65   :  { %4262 = shalt.err (!%p4259_p11)
}
  0x66   :  { %92 = dma.hbm_to_vmem [thread:$0]  %s5040_s7, 512, %s87_s21, [#allocation9], %s4319_s22, %s4319_s22, %s4320_s23  }
  0x67   :  { %s4263_s19 = scalar_lea.hbm %s5046_s13, 512 }
  0x68   :  { %p4264_p12 = scmp.ne.s32.totalorder %s5046_s13, %s4263_s19  ;;  %p4267_p13 = scmp.lt.u32.totalorder %s4263_s19, %s5046_s13 }
  0x6a   :  { %p4269_p0 = pnand %p4267_p13, %p4264_p12 }
  0x6c   :  { %4272 = shalt.err (!%p4269_p0)
}
  0x6d   :  { %s4273_s24 = scalar_lea.vmem %s4505_s27, 512  ;;  %p4278_p2 = scmp.lt.s32.totalorder %s4505_s27, %s4505_s27 }
  0x6e   :  { %p4274_p1 = scmp.ne.s32.totalorder %s4505_s27, %s4273_s24  ;;  %p4279_p3 = scmp.lt.s32.totalorder %s4273_s24, %s4273_s24 }
  0x70   :  { %p4280_p4 = por %p4279_p3, %p4278_p2 }
  0x72   :  { %p4281_p5 = pnand %p4280_p4, %p4274_p1 }
  0x74   :  { %4284 = shalt.err (!%p4281_p5)
}
  0x75   :  { %114 = dma.hbm_to_vmem [thread:$0]  %s5046_s13, 512, %s4505_s27, [#allocation12], %s4319_s22, %s4319_s22, %s4320_s23  }
  0x76   :  { %4307 = dma.done.wait [#allocation3], 256  }
  0x77   :  { %4308 = vsyncadd [#allocation3], 4294967040 }
  0x78   :  { %4309 = dma.done.wait [#allocation6], 1024  }
  0x79   :  { %4310 = vsyncadd [#allocation6], 4294966272 }
  0x7a   :  { %4311 = dma.done.wait [#allocation9], 1024  }
  0x7b   :  { %4312 = vsyncadd [#allocation9], 4294966272 }
  0x7c   :  { %4313 = dma.done.wait [#allocation12], 512  }
  0x7d   :  { %4314 = vsyncadd [#allocation12], 4294966784  ;;  %vm159_vm0 = vcmask 261120   ;;  %v148_v0 = vld [vmem:[#allocation5] sm:$0xff]  ;;  %v149_v1 = vld [vmem:[#allocation5 + $0x8] sm:$0xff]  ;;  %v4325_v8 = vmov 0.0   ;;  %v139_v20 = vlaneseq }
  0x7e   :  { %v150_v2 = vld [vmem:[#allocation5 + $0x10] sm:$0xff]  ;;  %v4001_v3 = vpack.c.bf16 %v149_v1, %v148_v0  ;;  %v151_v4 = vld [vmem:[#allocation5 + $0x18] sm:$0xff]  ;;  %3786 = vmatprep.subr.mxu1 %v4325_v8  ;;  %vm4326_vm1 = vmmov 0   ;;  %s4327_s14 = smov 64   ;;  %s4328_s17 = smov 96   ;;  %vm244_vm2 = vcmask 64512  }
  0x7f   :  { %v146_v5 = vld [vmem:[#allocation2] sm:$0xff]  ;;  %v4005_v6 = vpack.c.bf16 %v151_v4, %v150_v2  ;;  %v147_v7 = vld [vmem:[#allocation2 + $0x8] sm:$0xff]  ;;  %3788 = vmatprep.mubr.msk.f32.mxu1 %vm4326_vm1, %v4325_v8  ;;  %s4329_s28 = smov 88   ;;  %s4330_s30 = smov 120   ;;  %v140_v21 = vshrl.u32 %v139_v20, 7  ;;  %v142_v22 = vand.u32 127, %v139_v20 }
  0x80   :  { %3783 = vmatprep.mubr.msk.f32.mxu0 %vm159_vm0, %v146_v5  ;;  %4002 = vmatprep.subr.bf16.mxu0 %v4001_v3  ;;  %v3605_v9 = vld [vmem:[%s5035_s2] ss:$0 sm:$0xff]  ;;  %s4331_s2 = smov 80   ;;  %s4332_s3 = smov 112   ;;  %vm922_vm4 = vcmask 130048   ;;  %vm924_vm5 = vcmask 195584  }
  0x81   :  { %4004 = vmatpush3.bf16.msra.mxu0 %v4001_v3  ;;  %s4333_s29 = smov 104   ;;  %vm4587_vm3 = vcmp.ge.s32.totalorder %v140_v21, %v142_v22  ;;  %s4334_s18 = smov 72  }
  0x82   :  { %4006 = vmatprep.subr.bf16.mxu0 %v4005_v6  ;;  %s4335_s1 = smov 48   ;;  %s4336_s26 = smov 56  }
  0x83   :  { %s4337_s19 = smov 40   ;;  %s4338_s20 = smov 16  }
  0x84   :  { %s4339_s5 = smov 24  }
  0x85   :  { %4008 = vmatpush3.bf16.msra.mxu0 %v4005_v6 }
  0x86   :  { %3806 = vmatprep.subr.mxu0 %v4325_v8 }
  0x88   :  { %3784 = vmatmul.mubr.msk.f32.vlgmr.msra.gmra.mrb[0].mxu0 %vm159_vm0, %v147_v7 }
  0x89   :  { %3808 = vmatprep.mubr.msk.f32.mxu0 %vm4326_vm1, %v4325_v8 }
 0x15b   :  { %v3785_v10 = vpop.f32.mrb[0].mxu0 }
 0x15c   :  { %v4553_v11 = vadd.f32 %v3785_v10, %v3605_v9  ;;  %v232_v12 = vpop.f32.mrb[1].mxu0 }
 0x15d   :  { %v4555_v13 = vadd.f32 %v3605_v9, %v232_v12 }
 0x15f   :  { %332 = vrot.lane.b32.xlu1 %v4555_v13, %s4327_s14  ;;  %242 = vrot.lane.b32.xlu0 %v4555_v13, %s4328_s17 }
 0x163   :  { %410 = vrot.lane.b32.xlu1 %v4555_v13, %s4329_s28 }
 0x167   :  { %408 = vrot.lane.b32.xlu1 %v4555_v13, %s4330_s30 }
 0x16b   :  { %577 = vrot.lane.b32.xlu1 %v4555_v13, %s4331_s2 }
 0x16f   :  { %575 = vrot.lane.b32.xlu1 %v4555_v13, %s4332_s3 }
 0x173   :  { %742 = vrot.lane.b32.xlu1 %v4555_v13, %s4333_s29 }
 0x1d1   :  { %v333_v14 = vpop.permute.xlu1 %332  ;;  %v243_v15 = vpop.permute.xlu0 %242 }
 0x1d2   :  { %3787 = vmatpush3.xpose.msk.msra.mxu1 %vm244_vm2, %v243_v15 }
 0x1d3   :  { %3791 = vmatprep.subr.mxu1 %v4325_v8 }
 0x1d5   :  { %v4573_v16 = vpop.permute.xlu1 %410  ;;  %3789 = vmatmul.mubr.msk.f32.vlgmr.msra.gmra.mrb[0].mxu1 %vm244_vm2, %v4555_v13 }
 0x1d6   :  { %3792 = vmatpush3.msra.mxu1 %v333_v14  ;;  %3793 = vmatprep.mubr.msk.f32.mxu1 %vm4326_vm1, %v4325_v8 }
 0x1d7   :  { %3796 = vmatprep.subr.mxu1 %v4325_v8 }
 0x1d9   :  { %v4580_v17 = vpop.permute.xlu1 %408 }
 0x1dd   :  { %v578_v18 = vpop.permute.xlu1 %577 }
 0x1de   :  { %3807 = vmatpush3.xpose.msk.msra.mxu0 %vm244_vm2, %v578_v18 }
 0x1df   :  { %3816 = vmatprep.subr.mxu0 %v4325_v8 }
 0x1e1   :  { %v576_v19 = vpop.permute.xlu1 %575 }
 0x1e2   :  { %3809 = vmatmul.mubr.msk.f32.vlgmr.msra.gmra.mrb[2].mxu0 %vm244_vm2, %v576_v19 }
 0x1e3   :  { %3818 = vmatprep.mubr.msk.f32.mxu0 %vm4326_vm1, %v4325_v8 }
 0x1e5   :  { %v743_v38 = vpop.permute.xlu1 %742 }
 0x2a8   :  { %v315_v23 = vpop.f32.mrb[0].mxu1 }
 0x2a9   :  { %v319_v25 = vmul.f32 0.35355338, %v315_v23  ;;  %v3790_v26 = vpop.f32.mrb[1].mxu1 }
 0x2ab   :  { %v320_v27 = vsel %vm4587_vm3, %v319_v25, -1e+09 }
 0x2ac   :  { %v321_v28 = vsel %vm244_vm2, %v320_v27, -inf }
 0x2ad   :  { %322 = vmax.xlane.f32.xlu0 %v321_v28 }
 0x2b5   :  { %v649_v29 = vpop.f32.mrb[2].mxu0 }
 0x2b6   :  { %v3810_v30 = vpop.f32.mrb[3].mxu0  ;;  %v653_v31 = vmul.f32 0.35355338, %v649_v29 }
 0x2b8   :  { %v4602_v32 = vsel %vm4587_vm3, %v653_v31, -1e+09 }
 0x2b9   :  { %v655_v33 = vsel %vm244_vm2, %v4602_v32, -inf }
 0x2c3   :  { %744 = vrot.lane.b32.xlu0 %v4555_v13, %s4334_s18 }
 0x2c7   :  { %1259 = vrot.lane.b32.xlu0 %v4553_v11, %s4332_s3 }
 0x2cb   :  { %1426 = vrot.lane.b32.xlu0 %v4553_v11, %s4333_s29 }
 0x2ea   :  { %656 = vmax.xlane.f32.xlu0 %v655_v33 }
 0x33a   :  { %v323_v34 = vpop.xlane.xlu0 %322 }
 0x33b   :  { %v324_v35 = vsub.f32 %v320_v27, %v323_v34 }
 0x33d   :  { %v325_v36 = vmul.f32 1.442695, %v324_v35 }
 0x33e   :  { %v745_v37 = vpop.permute.xlu0 %744 }
 0x33f   :  { %4073 = vpow2.f32 %v325_v36  ;;  %3817 = vmatpush3.xpose.msk.msra.mxu0 %vm244_vm2, %v745_v37 }
 0x340   :  { %3826 = vmatprep.subr.mxu0 %v4325_v8 }
 0x342   :  { %3819 = vmatmul.mubr.msk.f32.vlgmr.msra.gmra.mrb[4].mxu0 %vm244_vm2, %v743_v38  ;;  %v1260_v48 = vpop.permute.xlu0 %1259 }
 0x343   :  { %3828 = vmatprep.mubr.msk.f32.mxu0 %vm4326_vm1, %v4325_v8 }
 0x346   :  { %v1427_v50 = vpop.permute.xlu0 %1426 }
 0x349   :  { %v4074_v39 = vpop.eup %4073 }
 0x34a   :  { %v327_v40 = vsel %vm244_vm2, %v4074_v39, 0.0 }
 0x34b   :  { %328 = vadd.xlane.f32.xlu1 %v327_v40 }
 0x35c   :  { %927 = vrot.lane.b32.xlu1 %v4553_v11, %s4328_s17 }
 0x360   :  { %1094 = vrot.lane.b32.xlu1 %v4553_v11, %s4329_s28 }
 0x364   :  { %1092 = vrot.lane.b32.xlu1 %v4553_v11, %s4330_s30 }
 0x368   :  { %1261 = vrot.lane.b32.xlu1 %v4553_v11, %s4331_s2 }
 0x36c   :  { %1428 = vrot.lane.b32.xlu1 %v4553_v11, %s4334_s18 }
 0x377   :  { %v657_v56 = vpop.xlane.xlu0 %656 }
 0x378   :  { %v658_v60 = vsub.f32 %v4602_v32, %v657_v56 }
 0x37a   :  { %v659_v2 = vmul.f32 1.442695, %v658_v60 }
 0x3d8   :  { %v329_v41 = vpop.xlane.xlu1 %328 }
 0x3d9   :  { %4075 = vrcp.f32 %v329_v41 }
 0x3da   :  { %4077 = vpow2.f32 %v659_v2 }
 0x3dc   :  { %v928_v42 = vpop.permute.xlu1 %927 }
 0x3dd   :  { %3827 = vmatpush3.xpose.msk.msra.mxu0 %vm244_vm2, %v928_v42 }
 0x3de   :  { %3836 = vmatprep.subr.mxu0 %v4325_v8 }
 0x3e0   :  { %v1095_v43 = vpop.permute.xlu1 %1094  ;;  %3829 = vmatmul.mubr.msk.f32.vlgmr.msra.gmra.mrb[6].mxu0 %vm244_vm2, %v4553_v11 }
 0x3e1   :  { %3837 = vmatpush3.xpose.msk.msra.mxu0 %vm244_vm2, %v1095_v43  ;;  %3838 = vmatprep.mubr.msk.f32.mxu0 %vm4326_vm1, %v4325_v8 }
 0x3e2   :  { %3846 = vmatprep.subr.mxu0 %v4325_v8 }
 0x3e3   :  { %v4076_v44 = vpop.eup %4075 }
 0x3e4   :  { %v331_v45 = vmul.f32 %v4076_v44, %v4074_v39  ;;  %v1093_v46 = vpop.permute.xlu1 %1092  ;;  %v4670_v28 = vpop.eup %4077 }
 0x3e5   :  { %3839 = vmatmul.mubr.msk.f32.vlgmr.msra.gmra.mrb[8].mxu0 %vm244_vm2, %v1093_v46  ;;  %v661_v31 = vsel %vm244_vm2, %v4670_v28, 0.0 }
 0x3e6   :  { %3794 = vmatmul.mubr.msk.f32.vlgmr.msra.gmra.mrb[2].mxu1 %vm244_vm2, %v331_v45  ;;  %3848 = vmatprep.mubr.msk.f32.mxu0 %vm4326_vm1, %v4325_v8 }
 0x3e7   :  { %3797 = vmatpush3.xpose.msk.msra.mxu1 %vm244_vm2, %v4573_v16  ;;  %3798 = vmatprep.mubr.msk.f32.mxu1 %vm4326_vm1, %v4325_v8 }
 0x3e8   :  { %v1262_v47 = vpop.permute.xlu1 %1261  ;;  %3801 = vmatprep.subr.mxu1 %v4325_v8 }
 0x3e9   :  { %3847 = vmatpush3.xpose.msk.msra.mxu0 %vm244_vm2, %v1262_v47 }
 0x3ea   :  { %3799 = vmatmul.mubr.msk.f32.vlgmr.msra.gmra.mrb[4].mxu1 %vm244_vm2, %v4580_v17  ;;  %3856 = vmatprep.subr.mxu0 %v4325_v8 }
 0x3eb   :  { %3803 = vmatprep.mubr.msk.f32.mxu1 %vm4326_vm1, %v4325_v8 }
 0x3ec   :  { %v1429_v49 = vpop.permute.xlu1 %1428  ;;  %3849 = vmatmul.mubr.msk.f32.vlgmr.msra.gmra.mrb[10].mxu0 %vm244_vm2, %v1260_v48 }
 0x3ed   :  { %3857 = vmatpush3.xpose.msk.msra.mxu0 %vm244_vm2, %v1429_v49  ;;  %3858 = vmatprep.mubr.msk.f32.mxu0 %vm4326_vm1, %v4325_v8 }
 0x3f0   :  { %3859 = vmatmul.mubr.msk.f32.vlgmr.msra.gmra.mrb[12].mxu0 %vm244_vm2, %v1427_v50 }
 0x415   :  { %v816_v51 = vpop.f32.mrb[4].mxu0 }
 0x416   :  { %v820_v52 = vmul.f32 0.35355338, %v816_v51  ;;  %v3820_v53 = vpop.f32.mrb[5].mxu0 }
 0x418   :  { %v821_v54 = vsel %vm4587_vm3, %v820_v52, -1e+09 }
 0x419   :  { %v822_v55 = vsel %vm244_vm2, %v821_v54, -inf }
 0x41a   :  { %823 = vmax.xlane.f32.xlu0 %v822_v55 }
 0x4a7   :  { %v824_v59 = vpop.xlane.xlu0 %823 }
 0x4a8   :  { %v825_v61 = vsub.f32 %v821_v54, %v824_v59 }
 0x4aa   :  { %v826_v5 = vmul.f32 1.442695, %v825_v61 }
 0x4ac   :  { %4079 = vpow2.f32 %v826_v5 }
 0x4b3   :  { %v999_v57 = vpop.f32.mrb[6].mxu0 }
 0x4b4   :  { %v3830_v58 = vpop.f32.mrb[7].mxu0  ;;  %v1003_v9 = vmul.f32 0.35355338, %v999_v57 }
 0x4b6   :  { %v1004_v19 = vsel %vm4587_vm3, %v1003_v9, -1e+09  ;;  %v4673_v30 = vpop.eup %4079 }
 0x4b7   :  { %v1005_v23 = vsel %vm244_vm2, %v1004_v19, -inf  ;;  %v828_v32 = vsel %vm244_vm2, %v4673_v30, 0.0 }
 0x4b8   :  { %v1166_v62 = vpop.f32.mrb[8].mxu0 }
 0x4b9   :  { %v1170_v63 = vmul.f32 0.35355338, %v1166_v62  ;;  %v4654_v0 = vpop.f32.mrb[2].mxu1  ;;  %v3840_v1 = vpop.f32.mrb[9].mxu0 }
 0x4ba   :  { %v3795_v3 = vpop.f32.mrb[3].mxu1 }
 0x4bb   :  { %v1171_v4 = vsel %vm4587_vm3, %v1170_v63, -1e+09 }
 0x4bc   :  { %v1172_v6 = vsel %vm244_vm2, %v1171_v4, -inf }
 0x4bd   :  { %1173 = vmax.xlane.f32.xlu0 %v1172_v6  ;;  %v482_v7 = vpop.f32.mrb[4].mxu1 }
 0x4be   :  { %v486_v10 = vmul.f32 0.35355338, %v482_v7  ;;  %v3800_v12 = vpop.f32.mrb[5].mxu1 }
 0x4bf   :  { %v1333_v14 = vpop.f32.mrb[10].mxu0 }
 0x4c0   :  { %v3850_v15 = vpop.f32.mrb[11].mxu0  ;;  %v487_v16 = vsel %vm4587_vm3, %v486_v10, -1e+09  ;;  %v1337_v18 = vmul.f32 0.35355338, %v1333_v14 }
 0x4c1   :  { %v488_v17 = vsel %vm244_vm2, %v487_v16, -inf }
 0x4c2   :  { %489 = vmax.xlane.f32.xlu1 %v488_v17  ;;  %v1338_v26 = vsel %vm4587_vm3, %v1337_v18, -1e+09 }
 0x4c3   :  { %v1500_v20 = vpop.f32.mrb[12].mxu0  ;;  %v1339_v29 = vsel %vm244_vm2, %v1338_v26, -inf }
 0x4c4   :  { %v1504_v21 = vmul.f32 0.35355338, %v1500_v20  ;;  %v3860_v22 = vpop.f32.mrb[13].mxu0 }
 0x4c6   :  { %1006 = vmax.xlane.f32.xlu1 %v1005_v23  ;;  %v1505_v25 = vsel %vm4587_vm3, %v1504_v21, -1e+09 }
 0x4c7   :  { %v1506_v27 = vsel %vm244_vm2, %v1505_v25, -inf }
 0x4c8   :  { %1507 = vmax.xlane.f32.xlu0 %v1506_v27  ;;  %v1608_v27 = vld [vmem:[#allocation7] sm:$0xff] }
 0x4ca   :  { %1340 = vmax.xlane.f32.xlu1 %v1339_v29 }
 0x4cc   :  { %662 = vadd.xlane.f32.xlu0 %v661_v31 }
 0x4ce   :  { %829 = vadd.xlane.f32.xlu1 %v828_v32  ;;  %v1610_v32 = vld [vmem:[#allocation7 + $0x10] sm:$0xff] }
 0x54a   :  { %v1174_v33 = vpop.xlane.xlu0 %1173 }
 0x54b   :  { %v1175_v34 = vsub.f32 %v1171_v4, %v1174_v33  ;;  %v1611_v33 = vld [vmem:[#allocation7 + $0x18] sm:$0xff] }
 0x54d   :  { %v1176_v35 = vmul.f32 1.442695, %v1175_v34 }
 0x54f   :  { %4081 = vpow2.f32 %v1176_v35  ;;  %v490_v36 = vpop.xlane.xlu1 %489  ;;  %v4013_v35 = vpack.c.bf16 %v1611_v33, %v1610_v32 }
 0x550   :  { %v491_v54 = vsub.f32 %v487_v16, %v490_v36 }
 0x552   :  { %v492_v55 = vmul.f32 1.442695, %v491_v54 }
 0x553   :  { %v1007_v37 = vpop.xlane.xlu1 %1006 }
 0x554   :  { %v1008_v38 = vsub.f32 %v1004_v19, %v1007_v37 }
 0x555   :  { %v1508_v39 = vpop.xlane.xlu0 %1507 }
 0x556   :  { %v1009_v40 = vmul.f32 1.442695, %v1008_v38  ;;  %v1509_v41 = vsub.f32 %v1505_v25, %v1508_v39 }
 0x557   :  { %v1341_v42 = vpop.xlane.xlu1 %1340 }
 0x558   :  { %4083 = vpow2.f32 %v1009_v40  ;;  %v1510_v43 = vmul.f32 1.442695, %v1509_v41  ;;  %v1342_v44 = vsub.f32 %v1338_v26, %v1341_v42 }
 0x559   :  { %v4679_v45 = vpop.eup %4081  ;;  %v663_v58 = vpop.xlane.xlu0 %662 }
 0x55a   :  { %4085 = vpow2.f32 %v1510_v43  ;;  %v1343_v46 = vmul.f32 1.442695, %v1342_v44  ;;  %v1178_v47 = vsel %vm244_vm2, %v4679_v45, 0.0 }
 0x55b   :  { %1179 = vadd.xlane.f32.xlu1 %v1178_v47  ;;  %v830_v62 = vpop.xlane.xlu1 %829 }
 0x55c   :  { %4087 = vpow2.f32 %v1343_v46 }
 0x55d   :  { %4089 = vpow2.f32 %v492_v55 }
 0x562   :  { %v4683_v48 = vpop.eup %4083 }
 0x563   :  { %v1011_v49 = vsel %vm244_vm2, %v4683_v48, 0.0 }
 0x564   :  { %v4687_v50 = vpop.eup %4085  ;;  %1012 = vadd.xlane.f32.xlu0 %v1011_v49 }
 0x565   :  { %v1512_v51 = vsel %vm244_vm2, %v4687_v50, 0.0 }
 0x566   :  { %v4691_v52 = vpop.eup %4087  ;;  %1513 = vadd.xlane.f32.xlu1 %v1512_v51 }
 0x567   :  { %v1345_v53 = vsel %vm244_vm2, %v4691_v52, 0.0  ;;  %v4090_v56 = vpop.eup %4089 }
 0x568   :  { %1346 = vadd.xlane.f32.xlu0 %v1345_v53  ;;  %v494_v57 = vsel %vm244_vm2, %v4090_v56, 0.0 }
 0x577   :  { %666 = vrot.lane.b32.xlu1 %v4555_v13, %s4335_s1 }
 0x57e   :  { %499 = vrot.lane.b32.xlu0 %v4555_v13, %s4336_s26 }
 0x582   :  { %1016 = vrot.lane.b32.xlu0 %v4553_v11, %s4327_s14 }
 0x586   :  { %1350 = vrot.lane.b32.xlu0 %v4553_v11, %s4335_s1 }
 0x59b   :  { %495 = vadd.xlane.f32.xlu1 %v494_v57 }
 0x5ac   :  { %833 = vrot.lane.b32.xlu1 %v4555_v13, %s4337_s19 }
 0x5b0   :  { %1183 = vrot.lane.b32.xlu1 %v4553_v11, %s4336_s26 }
 0x5b4   :  { %1517 = vrot.lane.b32.xlu1 %v4553_v11, %s4337_s19 }
 0x5e8   :  { %v1180_v63 = vpop.xlane.xlu1 %1179 }
 0x5f1   :  { %v1013_v59 = vpop.xlane.xlu0 %1012 }
 0x5f3   :  { %v1514_v1 = vpop.xlane.xlu1 %1513 }
 0x5f5   :  { %v1347_v60 = vpop.xlane.xlu0 %1346 }
 0x5f7   :  { %v667_v2 = vpop.permute.xlu1 %666 }
 0x5f9   :  { %v500_v61 = vpop.permute.xlu0 %499 }
 0x5fa   :  { %3802 = vmatpush3.msra.mxu1 %v500_v61 }
 0x5fb   :  { %3811 = vmatprep.subr.mxu1 %v4325_v8 }
 0x5fd   :  { %v1017_v12 = vpop.permute.xlu0 %1016 }
 0x601   :  { %v1351_v19 = vpop.permute.xlu0 %1350 }
 0x628   :  { %v496_v3 = vpop.xlane.xlu1 %495 }
 0x629   :  { %4091 = vrcp.f32 %v496_v3 }
 0x62a   :  { %4093 = vrcp.f32 %v663_v58 }
 0x62b   :  { %4095 = vrcp.f32 %v830_v62 }
 0x62c   :  { %4097 = vrcp.f32 %v1013_v59  ;;  %v834_v7 = vpop.permute.xlu1 %833 }
 0x62d   :  { %4099 = vrcp.f32 %v1180_v63 }
 0x62e   :  { %4101 = vrcp.f32 %v1347_v60 }
 0x62f   :  { %4103 = vrcp.f32 %v1514_v1 }
 0x630   :  { %v1184_v16 = vpop.permute.xlu1 %1183 }
 0x633   :  { %v4092_v13 = vpop.eup %4091 }
 0x634   :  { %v498_v4 = vmul.f32 %v4092_v13, %v4090_v56  ;;  %v4094_v5 = vpop.eup %4093  ;;  %v1518_v22 = vpop.permute.xlu1 %1517 }
 0x635   :  { %v665_v11 = vmul.f32 %v4094_v5, %v4670_v28  ;;  %v4096_v6 = vpop.eup %4095  ;;  %v1609_v28 = vld [vmem:[#allocation7 + $0x8] sm:$0xff] }
 0x636   :  { %3804 = vmatmul.mubr.msk.f32.vlgmr.msra.gmra.mrb[6].mxu1 %vm244_vm2, %v498_v4  ;;  %v832_v9 = vmul.f32 %v4096_v6, %v4673_v30  ;;  %v4098_v10 = vpop.eup %4097  ;;  %v4009_v30 = vpack.c.bf16 %v1609_v28, %v1608_v27  ;;  %v4775_v27 = vld [vmem:[%s5043_s10] ss:$0 sm:$0xff] }
 0x637   :  { %3812 = vmatpush3.msra.mxu1 %v667_v2  ;;  %3813 = vmatprep.mubr.msk.f32.mxu1 %vm4326_vm1, %v4325_v8  ;;  %v1015_v14 = vmul.f32 %v4098_v10, %v4683_v48  ;;  %v4100_v15 = vpop.eup %4099  ;;  %v1744_v10 = vld [vmem:[#allocation8 + $0x8] sm:$0xff] }
 0x638   :  { %3821 = vmatprep.subr.mxu1 %v4325_v8  ;;  %v1182_v17 = vmul.f32 %v4100_v15, %v4679_v45  ;;  %v4102_v18 = vpop.eup %4101  ;;  %4010 = vmatprep.subr.bf16.mxu0 %v4009_v30  ;;  %v1746_v15 = vld [vmem:[#allocation8 + $0x18] sm:$0xff] }
 0x639   :  { %v1349_v20 = vmul.f32 %v4102_v18, %v4691_v52  ;;  %v4104_v21 = vpop.eup %4103  ;;  %4012 = vmatpush3.bf16.msra.mxu0 %v4009_v30 }
 0x63a   :  { %3814 = vmatmul.mubr.msk.f32.vlgmr.msra.gmra.mrb[8].mxu1 %vm244_vm2, %v665_v11  ;;  %v1516_v23 = vmul.f32 %v4104_v21, %v4687_v50  ;;  %4014 = vmatprep.subr.bf16.mxu0 %v4013_v35 }
 0x63b   :  { %3822 = vmatpush3.msra.mxu1 %v834_v7  ;;  %3823 = vmatprep.mubr.msk.f32.mxu1 %vm4326_vm1, %v4325_v8 }
 0x63c   :  { %3831 = vmatprep.subr.mxu1 %v4325_v8 }
 0x63d   :  { %4016 = vmatpush3.bf16.msra.mxu0 %v4013_v35 }
 0x63e   :  { %3824 = vmatmul.mubr.msk.f32.vlgmr.msra.gmra.mrb[10].mxu1 %vm244_vm2, %v832_v9  ;;  %3888 = vmatprep.subr.mxu0 %v4325_v8  ;;  %v1743_v9 = vld [vmem:[#allocation8] sm:$0xff] }
 0x63f   :  { %3832 = vmatpush3.msra.mxu1 %v1017_v12  ;;  %3833 = vmatprep.mubr.msk.f32.mxu1 %vm4326_vm1, %v4325_v8  ;;  %v4017_v12 = vpack.c.bf16 %v1744_v10, %v1743_v9 }
 0x640   :  { %3841 = vmatprep.subr.mxu1 %v4325_v8 }
 0x642   :  { %3834 = vmatmul.mubr.msk.f32.vlgmr.msra.gmra.mrb[12].mxu1 %vm244_vm2, %v1015_v14  ;;  %v1745_v14 = vld [vmem:[#allocation8 + $0x10] sm:$0xff] }
 0x643   :  { %3842 = vmatpush3.msra.mxu1 %v1184_v16  ;;  %3843 = vmatprep.mubr.msk.f32.mxu1 %vm4326_vm1, %v4325_v8  ;;  %v4021_v16 = vpack.c.bf16 %v1746_v15, %v1745_v14 }
 0x644   :  { %3851 = vmatprep.subr.mxu1 %v4325_v8 }
 0x646   :  { %3844 = vmatmul.mubr.msk.f32.vlgmr.msra.gmra.mrb[14].mxu1 %vm244_vm2, %v1182_v17 }
 0x647   :  { %3852 = vmatpush3.msra.mxu1 %v1351_v19  ;;  %3853 = vmatprep.mubr.msk.f32.mxu1 %vm4326_vm1, %v4325_v8 }
 0x648   :  { %3861 = vmatprep.subr.mxu1 %v4325_v8 }
 0x64a   :  { %3854 = vmatmul.mubr.msk.f32.vlgmr.msra.gmra.mrb[16].mxu1 %vm244_vm2, %v1349_v20 }
 0x64b   :  { %3862 = vmatpush3.msra.mxu1 %v1518_v22  ;;  %3863 = vmatprep.mubr.msk.f32.mxu1 %vm4326_vm1, %v4325_v8 }
 0x64c   :  { %4018 = vmatprep.subr.bf16.mxu1 %v4017_v12 }
 0x64e   :  { %3864 = vmatmul.mubr.msk.f32.vlgmr.msra.gmra.mrb[18].mxu1 %vm244_vm2, %v1516_v23 }
 0x64f   :  { %4020 = vmatpush3.bf16.msra.mxu1 %v4017_v12 }
 0x650   :  { %4022 = vmatprep.subr.bf16.mxu1 %v4021_v16 }
 0x653   :  { %4024 = vmatpush3.bf16.msra.mxu1 %v4021_v16 }
 0x654   :  { %3893 = vmatprep.subr.mxu1 %v4325_v8 }
 0x709   :  { %v571_v25 = vpop.f32.mrb[6].mxu1 }
 0x70a   :  { %910 = vrot.lane.b32.xlu0 %v571_v25, %s4320_s23  ;;  %v3805_v26 = vpop.f32.mrb[7].mxu1  ;;  %v4770_v25 = vld [vmem:[%s5042_s9] ss:$0 sm:$0xff] }
 0x70d   :  { %v738_v29 = vpop.f32.mrb[8].mxu1 }
 0x70e   :  { %914 = vrot.lane.b32.xlu1 %v738_v29, %s4338_s20  ;;  %v3815_v31 = vpop.f32.mrb[9].mxu1 }
 0x711   :  { %v905_v34 = vpop.f32.mrb[10].mxu1 }
 0x712   :  { %918 = vrot.lane.b32.xlu1 %v905_v34, %s4339_s5  ;;  %v3825_v36 = vpop.f32.mrb[11].mxu1  ;;  %v3637_v34 = vld [vmem:[%s5039_s6] ss:$0 sm:$0xff] }
 0x715   :  { %v1088_v37 = vpop.f32.mrb[12].mxu1 }
 0x716   :  { %v3835_v38 = vpop.f32.mrb[13].mxu1 }
 0x719   :  { %v1255_v39 = vpop.f32.mrb[14].mxu1 }
 0x71a   :  { %1594 = vrot.lane.b32.xlu0 %v1255_v39, %s4320_s23  ;;  %v3845_v40 = vpop.f32.mrb[15].mxu1 }
 0x71d   :  { %v1422_v41 = vpop.f32.mrb[16].mxu1 }
 0x71e   :  { %1598 = vrot.lane.b32.xlu0 %v1422_v41, %s4338_s20  ;;  %v3855_v42 = vpop.f32.mrb[17].mxu1 }
 0x721   :  { %v1589_v43 = vpop.f32.mrb[18].mxu1 }
 0x722   :  { %1602 = vrot.lane.b32.xlu1 %v1589_v43, %s4339_s5  ;;  %v3865_v44 = vpop.f32.mrb[19].mxu1 }
 0x77c   :  { %v911_v45 = vpop.permute.xlu0 %910 }
 0x77d   :  { %v921_v47 = vsel %vm244_vm2, %v4654_v0, %v911_v45  ;;  %v3632_v0 = vld [vmem:[%s5037_s4] ss:$0 sm:$0xff] }
 0x780   :  { %v915_v46 = vpop.permute.xlu1 %914 }
 0x781   :  { %v923_v48 = vsel %vm922_vm4, %v921_v47, %v915_v46 }
 0x784   :  { %v919_v49 = vpop.permute.xlu1 %918 }
 0x785   :  { %v925_v50 = vsel %vm924_vm5, %v923_v48, %v919_v49 }
 0x786   :  { %3874 = vmatprep.mubr.msk.f32.mxu0 %vm159_vm0, %v925_v50 }
 0x78c   :  { %v1595_v51 = vpop.permute.xlu0 %1594 }
 0x78d   :  { %v1605_v53 = vsel %vm244_vm2, %v1088_v37, %v1595_v51 }
 0x790   :  { %v1599_v52 = vpop.permute.xlu0 %1598 }
 0x791   :  { %v1606_v54 = vsel %vm922_vm4, %v1605_v53, %v1599_v52 }
 0x794   :  { %v1603_v55 = vpop.permute.xlu1 %1602 }
 0x795   :  { %v1607_v56 = vsel %vm924_vm5, %v1606_v54, %v1603_v55 }
 0x796   :  { %3875 = vmatmul.mubr.msk.f32.vlgmr.msra.gmra.mrb[14].mxu0 %vm159_vm0, %v1607_v56 }
 0x797   :  { %3890 = vmatprep.mubr.msk.f32.mxu0 %vm4326_vm1, %v4325_v8 }
 0x869   :  { %v3876_v57 = vpop.f32.mrb[14].mxu0 }
 0x86a   :  { %v1697_v58 = vadd.f32 %v3876_v57, %v3632_v0  ;;  %v1691_v59 = vpop.f32.mrb[15].mxu0 }
 0x86b   :  { %v1692_v60 = vadd.f32 %v3632_v0, %v1691_v59 }
 0x86c   :  { %v1703_v61 = vsel %vm159_vm0, %v1697_v58, 0.0 }
 0x86d   :  { %1704 = vadd.xlane.f32.xlu1 %v1703_v61  ;;  %v1700_v62 = vsel %vm159_vm0, %v1692_v60, 0.0 }
 0x86e   :  { %1701 = vadd.xlane.f32.xlu0 %v1700_v62 }
 0x8fa   :  { %v1705_v63 = vpop.xlane.xlu1 %1704 }
 0x8fb   :  { %v1708_v1 = vmul.f32 0.03125, %v1705_v63  ;;  %v1702_v2 = vpop.xlane.xlu0 %1701 }
 0x8fc   :  { %v1707_v3 = vmul.f32 0.03125, %v1702_v2 }
 0x8fd   :  { %v1710_v13 = vsub.f32 %v1697_v58, %v1708_v1 }
 0x8fe   :  { %v1709_v4 = vsub.f32 %v1692_v60, %v1707_v3 }
 0x8ff   :  { %v1712_v6 = vmul.f32 %v1710_v13, %v1710_v13 }
 0x900   :  { %v1711_v5 = vmul.f32 %v1709_v4, %v1709_v4 }
 0x901   :  { %v1716_v7 = vsel %vm159_vm0, %v1712_v6, 0.0 }
 0x902   :  { %v1713_v11 = vsel %vm159_vm0, %v1711_v5, 0.0 }
 0x903   :  { %1714 = vadd.xlane.f32.xlu0 %v1713_v11 }
 0x907   :  { %1717 = vadd.xlane.f32.xlu0 %v1716_v7 }
 0x990   :  { %v1715_v17 = vpop.xlane.xlu0 %1714 }
 0x991   :  { %v1719_v18 = vmul.f32 0.03125, %v1715_v17 }
 0x993   :  { %v1721_v19 = vadd.f32 1e-05, %v1719_v18 }
 0x994   :  { %v1718_v20 = vpop.xlane.xlu0 %1717 }
 0x995   :  { %4105 = vrsqrt.f32 %v1721_v19  ;;  %v1720_v21 = vmul.f32 0.03125, %v1718_v20 }
 0x997   :  { %v1722_v22 = vadd.f32 1e-05, %v1720_v21 }
 0x999   :  { %4107 = vrsqrt.f32 %v1722_v22 }
 0x99f   :  { %v4106_v23 = vpop.eup %4105 }
 0x9a0   :  { %v1725_v26 = vmul.f32 %v4106_v23, %v1709_v4 }
 0x9a2   :  { %v1733_v28 = vmul.f32 %v4770_v25, %v1725_v26 }
 0x9a3   :  { %v4108_v29 = vpop.eup %4107 }
 0x9a4   :  { %v1726_v30 = vmul.f32 %v4108_v29, %v1710_v13  ;;  %v1741_v31 = vadd.f32 %v4775_v27, %v1733_v28 }
 0x9a6   :  { %3885 = vmatprep.mubr.msk.f32.mxu1 %vm159_vm0, %v1741_v31  ;;  %v1734_v32 = vmul.f32 %v4770_v25, %v1726_v30 }
 0x9a8   :  { %v1742_v33 = vadd.f32 %v4775_v27, %v1734_v32 }
 0x9aa   :  { %3886 = vmatmul.mubr.msk.f32.vlgmr.msra.gmra.mrb[20].mxu1 %vm159_vm0, %v1742_v33 }
 0x9ab   :  { %3895 = vmatprep.mubr.msk.f32.mxu1 %vm4326_vm1, %v4325_v8 }
 0xa7d   :  { %v3887_v35 = vpop.f32.mrb[20].mxu1 }
 0xa7e   :  { %v1826_v36 = vpop.f32.mrb[21].mxu1  ;;  %v4802_v38 = vadd.f32 %v3887_v35, %v3637_v34 }
 0xa7f   :  { %v4788_v37 = vadd.f32 %v3637_v34, %v1826_v36 }
 0xa81   :  { %2003 = vrot.lane.b32.xlu0 %v4788_v37, %s4329_s28  ;;  %1836 = vrot.lane.b32.xlu1 %v4788_v37, %s4328_s17 }
 0xa85   :  { %2168 = vrot.lane.b32.xlu0 %v4788_v37, %s4332_s3  ;;  %2001 = vrot.lane.b32.xlu1 %v4788_v37, %s4330_s30 }
 0xa89   :  { %2335 = vrot.lane.b32.xlu0 %v4788_v37, %s4333_s29  ;;  %2170 = vrot.lane.b32.xlu1 %v4788_v37, %s4331_s2 }
 0xa8d   :  { %2685 = vrot.lane.b32.xlu0 %v4802_v38, %s4329_s28  ;;  %2337 = vrot.lane.b32.xlu1 %v4788_v37, %s4334_s18 }
 0xa91   :  { %2852 = vrot.lane.b32.xlu0 %v4802_v38, %s4331_s2  ;;  %2518 = vrot.lane.b32.xlu1 %v4802_v38, %s4328_s17 }
 0xa95   :  { %3019 = vrot.lane.b32.xlu0 %v4802_v38, %s4334_s18  ;;  %2683 = vrot.lane.b32.xlu1 %v4802_v38, %s4330_s30 }
 0xa99   :  { %1925 = vrot.lane.b32.xlu0 %v4788_v37, %s4327_s14  ;;  %2850 = vrot.lane.b32.xlu1 %v4802_v38, %s4332_s3 }
 0xa9d   :  { %3017 = vrot.lane.b32.xlu1 %v4802_v38, %s4333_s29 }
 0xaa1   :  { %2092 = vrot.lane.b32.xlu1 %v4788_v37, %s4336_s26 }
 0xaf3   :  { %v2004_v39 = vpop.permute.xlu0 %2003  ;;  %v1837_v40 = vpop.permute.xlu1 %1836 }
 0xaf4   :  { %3889 = vmatpush3.xpose.msk.msra.mxu0 %vm244_vm2, %v1837_v40 }
 0xaf5   :  { %3898 = vmatprep.subr.mxu0 %v4325_v8 }
 0xaf7   :  { %v2169_v41 = vpop.permute.xlu0 %2168  ;;  %3891 = vmatmul.mubr.msk.f32.vlgmr.msra.gmra.mrb[16].mxu0 %vm244_vm2, %v4788_v37  ;;  %v2002_v42 = vpop.permute.xlu1 %2001 }
 0xaf8   :  { %3899 = vmatpush3.xpose.msk.msra.mxu0 %vm244_vm2, %v2004_v39  ;;  %3900 = vmatprep.mubr.msk.f32.mxu0 %vm4326_vm1, %v4325_v8 }
 0xaf9   :  { %3908 = vmatprep.subr.mxu0 %v4325_v8 }
 0xafb   :  { %v2336_v43 = vpop.permute.xlu0 %2335  ;;  %3901 = vmatmul.mubr.msk.f32.vlgmr.msra.gmra.mrb[18].mxu0 %vm244_vm2, %v2002_v42  ;;  %v2171_v44 = vpop.permute.xlu1 %2170 }
 0xafc   :  { %3909 = vmatpush3.xpose.msk.msra.mxu0 %vm244_vm2, %v2171_v44  ;;  %3910 = vmatprep.mubr.msk.f32.mxu0 %vm4326_vm1, %v4325_v8 }
 0xafd   :  { %3918 = vmatprep.subr.mxu0 %v4325_v8 }
 0xaff   :  { %v2686_v45 = vpop.permute.xlu0 %2685  ;;  %3911 = vmatmul.mubr.msk.f32.vlgmr.msra.gmra.mrb[20].mxu0 %vm244_vm2, %v2169_v41  ;;  %v2338_v46 = vpop.permute.xlu1 %2337 }
 0xb00   :  { %3919 = vmatpush3.xpose.msk.msra.mxu0 %vm244_vm2, %v2338_v46  ;;  %3920 = vmatprep.mubr.msk.f32.mxu0 %vm4326_vm1, %v4325_v8 }
 0xb01   :  { %3928 = vmatprep.subr.mxu0 %v4325_v8 }
 0xb03   :  { %v2853_v47 = vpop.permute.xlu0 %2852  ;;  %3921 = vmatmul.mubr.msk.f32.vlgmr.msra.gmra.mrb[22].mxu0 %vm244_vm2, %v2336_v43  ;;  %v2519_v48 = vpop.permute.xlu1 %2518 }
 0xb04   :  { %3929 = vmatpush3.xpose.msk.msra.mxu0 %vm244_vm2, %v2519_v48  ;;  %3930 = vmatprep.mubr.msk.f32.mxu0 %vm4326_vm1, %v4325_v8 }
 0xb05   :  { %3938 = vmatprep.subr.mxu0 %v4325_v8 }
 0xb07   :  { %v3020_v49 = vpop.permute.xlu0 %3019  ;;  %3931 = vmatmul.mubr.msk.f32.vlgmr.msra.gmra.mrb[24].mxu0 %vm244_vm2, %v4802_v38  ;;  %v2684_v50 = vpop.permute.xlu1 %2683 }
 0xb08   :  { %3939 = vmatpush3.xpose.msk.msra.mxu0 %vm244_vm2, %v2686_v45  ;;  %3940 = vmatprep.mubr.msk.f32.mxu0 %vm4326_vm1, %v4325_v8 }
 0xb09   :  { %3948 = vmatprep.subr.mxu0 %v4325_v8 }
 0xb0b   :  { %v1926_v51 = vpop.permute.xlu0 %1925  ;;  %3941 = vmatmul.mubr.msk.f32.vlgmr.msra.gmra.mrb[26].mxu0 %vm244_vm2, %v2684_v50  ;;  %v2851_v52 = vpop.permute.xlu1 %2850 }
 0xb0c   :  { %3894 = vmatpush3.msra.mxu1 %v1926_v51  ;;  %3949 = vmatpush3.xpose.msk.msra.mxu0 %vm244_vm2, %v2853_v47 }
 0xb0d   :  { %3950 = vmatprep.mubr.msk.f32.mxu0 %vm4326_vm1, %v4325_v8  ;;  %3958 = vmatprep.subr.mxu0 %v4325_v8 }
 0xb0e   :  { %3903 = vmatprep.subr.mxu1 %v4325_v8 }
 0xb0f   :  { %3951 = vmatmul.mubr.msk.f32.vlgmr.msra.gmra.mrb[28].mxu0 %vm244_vm2, %v2851_v52  ;;  %v3018_v53 = vpop.permute.xlu1 %3017 }
 0xb10   :  { %3959 = vmatpush3.xpose.msk.msra.mxu0 %vm244_vm2, %v3020_v49  ;;  %3960 = vmatprep.mubr.msk.f32.mxu0 %vm4326_vm1, %v4325_v8 }
 0xb13   :  { %3961 = vmatmul.mubr.msk.f32.vlgmr.msra.gmra.mrb[30].mxu0 %vm244_vm2, %v3018_v53  ;;  %v4892_v34 = vpop.permute.xlu1 %2092 }
 0xbca   :  { %v1908_v54 = vpop.f32.mrb[16].mxu0 }
 0xbcb   :  { %v1912_v55 = vmul.f32 0.35355338, %v1908_v54  ;;  %v3892_v56 = vpop.f32.mrb[17].mxu0 }
 0xbcd   :  { %v1913_v0 = vsel %vm4587_vm3, %v1912_v55, -1e+09 }
 0xbce   :  { %v2075_v57 = vpop.f32.mrb[18].mxu0  ;;  %v1914_v58 = vsel %vm244_vm2, %v1913_v0, -inf }
 0xbcf   :  { %v2079_v59 = vmul.f32 0.35355338, %v2075_v57  ;;  %1915 = vmax.xlane.f32.xlu0 %v1914_v58  ;;  %v3902_v60 = vpop.f32.mrb[19].mxu0 }
 0xbd1   :  { %v2080_v61 = vsel %vm4587_vm3, %v2079_v59, -1e+09 }
 0xbd2   :  { %v2242_v62 = vpop.f32.mrb[20].mxu0  ;;  %v2081_v63 = vsel %vm244_vm2, %v2080_v61, -inf }
 0xbd3   :  { %v2246_v1 = vmul.f32 0.35355338, %v2242_v62  ;;  %2082 = vmax.xlane.f32.xlu1 %v2081_v63  ;;  %v3912_v2 = vpop.f32.mrb[21].mxu0 }
 0xbd5   :  { %v2247_v3 = vsel %vm4587_vm3, %v2246_v1, -1e+09 }
 0xbd6   :  { %v2409_v13 = vpop.f32.mrb[22].mxu0  ;;  %v2248_v4 = vsel %vm244_vm2, %v2247_v3, -inf }
 0xbd7   :  { %v2413_v5 = vmul.f32 0.35355338, %v2409_v13  ;;  %2249 = vmax.xlane.f32.xlu0 %v2248_v4  ;;  %v3922_v11 = vpop.f32.mrb[23].mxu0 }
 0xbd9   :  { %v2414_v6 = vsel %vm4587_vm3, %v2413_v5, -1e+09 }
 0xbda   :  { %v2590_v7 = vpop.f32.mrb[24].mxu0  ;;  %v2415_v9 = vsel %vm244_vm2, %v2414_v6, -inf }
 0xbdb   :  { %v2594_v10 = vmul.f32 0.35355338, %v2590_v7  ;;  %2416 = vmax.xlane.f32.xlu0 %v2415_v9  ;;  %v3932_v12 = vpop.f32.mrb[25].mxu0 }
 0xbdd   :  { %v2595_v14 = vsel %vm4587_vm3, %v2594_v10, -1e+09 }
 0xbde   :  { %v2757_v15 = vpop.f32.mrb[26].mxu0  ;;  %v2596_v16 = vsel %vm244_vm2, %v2595_v14, -inf }
 0xbdf   :  { %v2761_v17 = vmul.f32 0.35355338, %v2757_v15  ;;  %2597 = vmax.xlane.f32.xlu1 %v2596_v16  ;;  %v3942_v18 = vpop.f32.mrb[27].mxu0 }
 0xbe1   :  { %v2762_v19 = vsel %vm4587_vm3, %v2761_v17, -1e+09 }
 0xbe2   :  { %v2924_v20 = vpop.f32.mrb[28].mxu0  ;;  %v2763_v21 = vsel %vm244_vm2, %v2762_v19, -inf }
 0xbe3   :  { %v2928_v22 = vmul.f32 0.35355338, %v2924_v20  ;;  %2764 = vmax.xlane.f32.xlu0 %v2763_v21  ;;  %v3952_v23 = vpop.f32.mrb[29].mxu0 }
 0xbe5   :  { %v2929_v26 = vsel %vm4587_vm3, %v2928_v22, -1e+09 }
 0xbe6   :  { %v3091_v28 = vpop.f32.mrb[30].mxu0  ;;  %v2930_v29 = vsel %vm244_vm2, %v2929_v26, -inf }
 0xbe7   :  { %v3095_v30 = vmul.f32 0.35355338, %v3091_v28  ;;  %2931 = vmax.xlane.f32.xlu1 %v2930_v29  ;;  %v3962_v31 = vpop.f32.mrb[31].mxu0 }
 0xbe9   :  { %v3096_v32 = vsel %vm4587_vm3, %v3095_v30, -1e+09 }
 0xbea   :  { %v3097_v33 = vsel %vm244_vm2, %v3096_v32, -inf }
 0xbeb   :  { %3098 = vmax.xlane.f32.xlu0 %v3097_v33 }
 0xbf8   :  { %2426 = vrot.lane.b32.xlu1 %v4788_v37, %s4337_s19 }
 0xc01   :  { %2259 = vrot.lane.b32.xlu0 %v4788_v37, %s4335_s1 }
 0xc5c   :  { %v1916_v35 = vpop.xlane.xlu0 %1915 }
 0xc5d   :  { %v1917_v36 = vsub.f32 %v1913_v0, %v1916_v35 }
 0xc5f   :  { %v1918_v39 = vmul.f32 1.442695, %v1917_v36 }
 0xc60   :  { %v2083_v40 = vpop.xlane.xlu1 %2082 }
 0xc61   :  { %4109 = vpow2.f32 %v1918_v39  ;;  %v2084_v41 = vsub.f32 %v2080_v61, %v2083_v40 }
 0xc63   :  { %v2085_v42 = vmul.f32 1.442695, %v2084_v41 }
 0xc64   :  { %v2250_v24 = vpop.xlane.xlu0 %2249 }
 0xc65   :  { %4111 = vpow2.f32 %v2085_v42  ;;  %v2251_v43 = vsub.f32 %v2247_v3, %v2250_v24 }
 0xc67   :  { %v2252_v44 = vmul.f32 1.442695, %v2251_v43 }
 0xc68   :  { %v2417_v45 = vpop.xlane.xlu0 %2416 }
 0xc69   :  { %4113 = vpow2.f32 %v2252_v44  ;;  %v2418_v46 = vsub.f32 %v2414_v6, %v2417_v45 }
 0xc6b   :  { %v4110_v47 = vpop.eup %4109  ;;  %v2419_v48 = vmul.f32 1.442695, %v2418_v46 }
 0xc6c   :  { %v1920_v37 = vsel %vm244_vm2, %v4110_v47, 0.0  ;;  %v2598_v55 = vpop.xlane.xlu1 %2597 }
 0xc6d   :  { %4115 = vpow2.f32 %v2419_v48  ;;  %1921 = vadd.xlane.f32.xlu1 %v1920_v37  ;;  %v2599_v56 = vsub.f32 %v2595_v14, %v2598_v55  ;;  %v3202_v55 = vld [vmem:[#allocation10 + $0x18] sm:$0xff] }
 0xc6f   :  { %v4112_v49 = vpop.eup %4111  ;;  %v2600_v59 = vmul.f32 1.442695, %v2599_v56 }
 0xc70   :  { %v2087_v50 = vsel %vm244_vm2, %v4112_v49, 0.0  ;;  %v2765_v0 = vpop.xlane.xlu0 %2764 }
 0xc71   :  { %2088 = vadd.xlane.f32.xlu0 %v2087_v50  ;;  %v2766_v58 = vsub.f32 %v2762_v19, %v2765_v0  ;;  %4117 = vpow2.f32 %v2600_v59 }
 0xc73   :  { %v4114_v51 = vpop.eup %4113  ;;  %v2767_v62 = vmul.f32 1.442695, %v2766_v58 }
 0xc74   :  { %v2254_v52 = vsel %vm244_vm2, %v4114_v51, 0.0  ;;  %v2932_v57 = vpop.xlane.xlu1 %2931 }
 0xc75   :  { %2255 = vadd.xlane.f32.xlu1 %v2254_v52  ;;  %v2933_v60 = vsub.f32 %v2929_v26, %v2932_v57  ;;  %4119 = vpow2.f32 %v2767_v62  ;;  %v3199_v52 = vld [vmem:[#allocation10] sm:$0xff] }
 0xc77   :  { %v4897_v53 = vpop.eup %4115  ;;  %v2934_v63 = vmul.f32 1.442695, %v2933_v60 }
 0xc78   :  { %v2421_v54 = vsel %vm244_vm2, %v4897_v53, 0.0  ;;  %v3099_v61 = vpop.xlane.xlu0 %3098  ;;  %v2427_v10 = vpop.permute.xlu1 %2426 }
 0xc79   :  { %2422 = vadd.xlane.f32.xlu0 %v2421_v54  ;;  %v3100_v1 = vsub.f32 %v3096_v32, %v3099_v61  ;;  %4121 = vpow2.f32 %v2934_v63  ;;  %v3201_v54 = vld [vmem:[#allocation10 + $0x10] sm:$0xff] }
 0xc7a   :  { %v4029_v56 = vpack.c.bf16 %v3202_v55, %v3201_v54 }
 0xc7b   :  { %v3101_v2 = vmul.f32 1.442695, %v3100_v1  ;;  %v4118_v3 = vpop.eup %4117 }
 0xc7c   :  { %v2602_v4 = vsel %vm244_vm2, %v4118_v3, 0.0  ;;  %v2260_v12 = vpop.permute.xlu0 %2259 }
 0xc7d   :  { %4123 = vpow2.f32 %v3101_v2 }
 0xc7f   :  { %v4905_v13 = vpop.eup %4119 }
 0xc80   :  { %v2769_v11 = vsel %vm244_vm2, %v4905_v13, 0.0 }
 0xc83   :  { %v4908_v5 = vpop.eup %4121 }
 0xc84   :  { %v2936_v6 = vsel %vm244_vm2, %v4908_v5, 0.0 }
 0xc86   :  { %2774 = vrot.lane.b32.xlu1 %v4802_v38, %s4336_s26 }
 0xc87   :  { %v4914_v7 = vpop.eup %4123 }
 0xc88   :  { %v3103_v9 = vsel %vm244_vm2, %v4914_v7, 0.0 }
 0xc8f   :  { %2607 = vrot.lane.b32.xlu0 %v4802_v38, %s4327_s14 }
 0xcaa   :  { %2603 = vadd.xlane.f32.xlu1 %v2602_v4 }
 0xcae   :  { %2770 = vadd.xlane.f32.xlu0 %v2769_v11  ;;  %2937 = vadd.xlane.f32.xlu1 %v2936_v6 }
 0xcb2   :  { %3104 = vadd.xlane.f32.xlu1 %v3103_v9 }
 0xcc3   :  { %3108 = vrot.lane.b32.xlu1 %v4802_v38, %s4337_s19 }
 0xcc4   :  { %2941 = vrot.lane.b32.xlu0 %v4802_v38, %s4335_s1 }
 0xcfa   :  { %v1922_v14 = vpop.xlane.xlu1 %1921 }
 0xcfb   :  { %4125 = vrcp.f32 %v1922_v14  ;;  %v3664_v14 = vld [vmem:[%s5041_s8] ss:$0 sm:$0xff] }
 0xcfe   :  { %v2089_v15 = vpop.xlane.xlu0 %2088 }
 0xcff   :  { %4127 = vrcp.f32 %v2089_v15 }
 0xd02   :  { %v2256_v16 = vpop.xlane.xlu1 %2255 }
 0xd03   :  { %4129 = vrcp.f32 %v2256_v16 }
 0xd05   :  { %v4126_v17 = vpop.eup %4125 }
 0xd06   :  { %v1924_v18 = vmul.f32 %v4126_v17, %v4110_v47  ;;  %v2423_v19 = vpop.xlane.xlu0 %2422  ;;  %v2775_v29 = vpop.permute.xlu1 %2774 }
 0xd07   :  { %4131 = vrcp.f32 %v2423_v19 }
 0xd08   :  { %3896 = vmatmul.mubr.msk.f32.vlgmr.msra.gmra.mrb[22].mxu1 %vm244_vm2, %v1924_v18 }
 0xd09   :  { %v4128_v20 = vpop.eup %4127  ;;  %3904 = vmatpush3.msra.mxu1 %v4892_v34  ;;  %3905 = vmatprep.mubr.msk.f32.mxu1 %vm4326_vm1, %v4325_v8 }
 0xd0a   :  { %v2091_v38 = vmul.f32 %v4128_v20, %v4112_v49  ;;  %3913 = vmatprep.subr.mxu1 %v4325_v8  ;;  %v2608_v28 = vpop.permute.xlu0 %2607 }
 0xd0c   :  { %3906 = vmatmul.mubr.msk.f32.vlgmr.msra.gmra.mrb[24].mxu1 %vm244_vm2, %v2091_v38 }
 0xd0d   :  { %v4130_v21 = vpop.eup %4129  ;;  %3914 = vmatpush3.msra.mxu1 %v2260_v12  ;;  %3915 = vmatprep.mubr.msk.f32.mxu1 %vm4326_vm1, %v4325_v8 }
 0xd0e   :  { %v2258_v22 = vmul.f32 %v4130_v21, %v4114_v51  ;;  %3923 = vmatprep.subr.mxu1 %v4325_v8 }
 0xd10   :  { %3916 = vmatmul.mubr.msk.f32.vlgmr.msra.gmra.mrb[26].mxu1 %vm244_vm2, %v2258_v22 }
 0xd11   :  { %v4132_v23 = vpop.eup %4131  ;;  %3924 = vmatpush3.msra.mxu1 %v2427_v10  ;;  %3925 = vmatprep.mubr.msk.f32.mxu1 %vm4326_vm1, %v4325_v8 }
 0xd12   :  { %v2425_v26 = vmul.f32 %v4132_v23, %v4897_v53  ;;  %3933 = vmatprep.subr.mxu1 %v4325_v8 }
 0xd14   :  { %3926 = vmatmul.mubr.msk.f32.vlgmr.msra.gmra.mrb[28].mxu1 %vm244_vm2, %v2425_v26 }
 0xd15   :  { %3934 = vmatpush3.msra.mxu1 %v2608_v28  ;;  %3935 = vmatprep.mubr.msk.f32.mxu1 %vm4326_vm1, %v4325_v8 }
 0xd16   :  { %3943 = vmatprep.subr.mxu1 %v4325_v8 }
 0xd37   :  { %v2604_v30 = vpop.xlane.xlu1 %2603 }
 0xd38   :  { %4133 = vrcp.f32 %v2604_v30 }
 0xd3b   :  { %v2771_v31 = vpop.xlane.xlu0 %2770  ;;  %v2938_v32 = vpop.xlane.xlu1 %2937 }
 0xd3c   :  { %4135 = vrcp.f32 %v2771_v31 }
 0xd3d   :  { %4137 = vrcp.f32 %v2938_v32 }
 0xd3f   :  { %v3105_v33 = vpop.xlane.xlu1 %3104  ;;  %v2942_v41 = vpop.permute.xlu0 %2941 }
 0xd40   :  { %4139 = vrcp.f32 %v3105_v33  ;;  %v3323_v33 = vld [vmem:[%s5044_s11] sm:$0xff] }
 0xd42   :  { %v4134_v34 = vpop.eup %4133 }
 0xd43   :  { %v2606_v35 = vmul.f32 %v4134_v34, %v4118_v3  ;;  %v3109_v43 = vpop.permute.xlu1 %3108  ;;  %v3324_v34 = vld [vmem:[%s5044_s11 + $0x8] sm:$0xff] }
 0xd45   :  { %3936 = vmatmul.mubr.msk.f32.vlgmr.msra.gmra.mrb[30].mxu1 %vm244_vm2, %v2606_v35  ;;  %v4033_v35 = vpack.c.bf16 %v3324_v34, %v3323_v33 }
 0xd46   :  { %v4136_v36 = vpop.eup %4135  ;;  %3944 = vmatpush3.msra.mxu1 %v2775_v29  ;;  %3945 = vmatprep.mubr.msk.f32.mxu1 %vm4326_vm1, %v4325_v8 }
 0xd47   :  { %v2773_v39 = vmul.f32 %v4136_v36, %v4905_v13  ;;  %3953 = vmatprep.subr.mxu1 %v4325_v8  ;;  %v4138_v40 = vpop.eup %4137  ;;  %v3325_v36 = vld [vmem:[%s5044_s11 + $0x10] sm:$0xff] }
 0xd48   :  { %v2940_v42 = vmul.f32 %v4138_v40, %v4908_v5 }
 0xd49   :  { %3946 = vmatmul.mubr.msk.f32.vlgmr.msra.gmra.mrb[32].mxu1 %vm244_vm2, %v2773_v39  ;;  %v3326_v39 = vld [vmem:[%s5044_s11 + $0x18] sm:$0xff] }
 0xd4a   :  { %3954 = vmatpush3.msra.mxu1 %v2942_v41  ;;  %3955 = vmatprep.mubr.msk.f32.mxu1 %vm4326_vm1, %v4325_v8  ;;  %v4140_v24 = vpop.eup %4139  ;;  %v4037_v40 = vpack.c.bf16 %v3326_v39, %v3325_v36 }
 0xd4b   :  { %3963 = vmatprep.subr.mxu1 %v4325_v8  ;;  %v3107_v44 = vmul.f32 %v4140_v24, %v4914_v7 }
 0xd4d   :  { %3956 = vmatmul.mubr.msk.f32.vlgmr.msra.gmra.mrb[34].mxu1 %vm244_vm2, %v2940_v42 }
 0xd4e   :  { %3964 = vmatpush3.msra.mxu1 %v3109_v43  ;;  %3965 = vmatprep.mubr.msk.f32.mxu1 %vm4326_vm1, %v4325_v8  ;;  %v3200_v8 = vld [vmem:[#allocation10 + $0x8] sm:$0xff] }
 0xd4f   :  { %v4025_v53 = vpack.c.bf16 %v3200_v8, %v3199_v52  ;;  %4034 = vmatprep.subr.bf16.mxu1 %v4033_v35  ;;  %v3667_v8 = vld [vmem:[%s5045_s12] ss:$0 sm:$0xff] }
 0xd51   :  { %3966 = vmatmul.mubr.msk.f32.vlgmr.msra.gmra.mrb[36].mxu1 %vm244_vm2, %v3107_v44  ;;  %4026 = vmatprep.subr.bf16.mxu0 %v4025_v53 }
 0xd52   :  { %4028 = vmatpush3.bf16.msra.mxu0 %v4025_v53  ;;  %4036 = vmatpush3.bf16.msra.mxu1 %v4033_v35 }
 0xd53   :  { %4030 = vmatprep.subr.bf16.mxu0 %v4029_v56  ;;  %4038 = vmatprep.subr.bf16.mxu1 %v4037_v40 }
 0xd56   :  { %4032 = vmatpush3.bf16.msra.mxu0 %v4029_v56  ;;  %4040 = vmatpush3.bf16.msra.mxu1 %v4037_v40 }
 0xddb   :  { %v1997_v45 = vpop.f32.mrb[22].mxu1 }
 0xddc   :  { %v3897_v46 = vpop.f32.mrb[23].mxu1 }
 0xddf   :  { %v2164_v47 = vpop.f32.mrb[24].mxu1 }
 0xde0   :  { %2503 = vrot.lane.b32.xlu0 %v2164_v47, %s4320_s23  ;;  %v3907_v48 = vpop.f32.mrb[25].mxu1 }
 0xde3   :  { %v2331_v37 = vpop.f32.mrb[26].mxu1 }
 0xde4   :  { %2507 = vrot.lane.b32.xlu1 %v2331_v37, %s4338_s20  ;;  %v3917_v49 = vpop.f32.mrb[27].mxu1 }
 0xde7   :  { %v2498_v50 = vpop.f32.mrb[28].mxu1 }
 0xde8   :  { %2511 = vrot.lane.b32.xlu1 %v2498_v50, %s4339_s5  ;;  %v3927_v51 = vpop.f32.mrb[29].mxu1 }
 0xe18   :  { %v2679_v0 = vpop.f32.mrb[30].mxu1 }
 0xe19   :  { %v3937_v57 = vpop.f32.mrb[31].mxu1 }
 0xe1c   :  { %v2846_v58 = vpop.f32.mrb[32].mxu1 }
 0xe1d   :  { %3185 = vrot.lane.b32.xlu0 %v2846_v58, %s4320_s23  ;;  %v3947_v59 = vpop.f32.mrb[33].mxu1 }
 0xe20   :  { %v3013_v60 = vpop.f32.mrb[34].mxu1 }
 0xe21   :  { %3189 = vrot.lane.b32.xlu0 %v3013_v60, %s4338_s20  ;;  %v3957_v61 = vpop.f32.mrb[35].mxu1 }
 0xe24   :  { %v3180_v62 = vpop.f32.mrb[36].mxu1 }
 0xe25   :  { %3193 = vrot.lane.b32.xlu1 %v3180_v62, %s4339_s5  ;;  %v3967_v63 = vpop.f32.mrb[37].mxu1  ;;  %s5062_s5 = sld [smem:[#allocation21_spill]] }
 0xe52   :  { %v2504_v1 = vpop.permute.xlu0 %2503 }
 0xe53   :  { %v2514_v3 = vsel %vm244_vm2, %v1997_v45, %v2504_v1 }
 0xe56   :  { %v2508_v2 = vpop.permute.xlu1 %2507 }
 0xe57   :  { %v2515_v13 = vsel %vm922_vm4, %v2514_v3, %v2508_v2 }
 0xe5a   :  { %v2512_v4 = vpop.permute.xlu1 %2511 }
 0xe5b   :  { %v2516_v5 = vsel %vm924_vm5, %v2515_v13, %v2512_v4  ;;  %v3459_v4 = vld [vmem:[#allocation11] sm:$0xff] }
 0xe5c   :  { %3976 = vmatprep.mubr.msk.f32.mxu0 %vm159_vm0, %v2516_v5  ;;  %v3460_v5 = vld [vmem:[#allocation11 + $0x8] sm:$0xff] }
 0xe8f   :  { %v3186_v11 = vpop.permute.xlu0 %3185 }
 0xe90   :  { %v3196_v7 = vsel %vm244_vm2, %v2679_v0, %v3186_v11  ;;  %v4041_v11 = vpack.c.bf16 %v3460_v5, %v3459_v4 }
 0xe92   :  { %4042 = vmatprep.subr.bf16.mxu0 %v4041_v11 }
 0xe93   :  { %v3190_v6 = vpop.permute.xlu0 %3189 }
 0xe94   :  { %v3197_v9 = vsel %vm922_vm4, %v3196_v7, %v3190_v6  ;;  %v3461_v6 = vld [vmem:[#allocation11 + $0x10] sm:$0xff]  ;;  %v3462_v7 = vld [vmem:[#allocation11 + $0x18] sm:$0xff] }
 0xe97   :  { %v3194_v10 = vpop.permute.xlu1 %3193 }
 0xe98   :  { %v3198_v12 = vsel %vm924_vm5, %v3197_v9, %v3194_v10  ;;  %v4045_v9 = vpack.c.bf16 %v3462_v7, %v3461_v6 }
 0xe99   :  { %3977 = vmatmul.mubr.msk.f32.vlgmr.msra.gmra.mrb[32].mxu0 %vm159_vm0, %v3198_v12 }
 0xe9a   :  { %4044 = vmatpush3.bf16.msra.mxu0 %v4041_v11 }
 0xe9b   :  { %4046 = vmatprep.subr.bf16.mxu0 %v4045_v9 }
 0xe9e   :  { %4048 = vmatpush3.bf16.msra.mxu0 %v4045_v9 }
 0xf6c   :  { %v3978_v15 = vpop.f32.mrb[32].mxu0 }
 0xf6d   :  { %v3288_v16 = vadd.f32 %v3978_v15, %v3664_v14  ;;  %v3282_v17 = vpop.f32.mrb[33].mxu0 }
 0xf6e   :  { %v3283_v18 = vadd.f32 %v3664_v14, %v3282_v17 }
 0xf6f   :  { %v3294_v19 = vsel %vm159_vm0, %v3288_v16, 0.0 }
 0xf70   :  { %3295 = vadd.xlane.f32.xlu1 %v3294_v19  ;;  %v3291_v20 = vsel %vm159_vm0, %v3283_v18, 0.0  ;;  %v3670_v19 = vld [vmem:[%s5048_s15] ss:$0 sm:$0xff]  ;;  %s4340_s15 = smov [#allocation13]  }
 0xf71   :  { %3292 = vadd.xlane.f32.xlu0 %v3291_v20 }
 0xffd   :  { %v3296_v38 = vpop.xlane.xlu1 %3295 }
 0xffe   :  { %v3298_v21 = vmul.f32 0.03125, %v3296_v38  ;;  %v3293_v22 = vpop.xlane.xlu0 %3292 }
 0xfff   :  { %v3297_v23 = vmul.f32 0.03125, %v3293_v22  ;;  %v3671_v22 = vld [vmem:[%s5049_s16] ss:$0 sm:$0xff]  ;;  %s3590_s16 = sshll.u32 %s4340_s15, 4  ;;  %s3591_s16 = int_to_ptr.vmem [resolvable:$true] %s3590_s16 }
0x1000   :  { %v3300_v26 = vsub.f32 %v3288_v16, %v3298_v21  ;;  %s4285_s25 = scalar_lea.vmem %s3591_s16, 256  ;;  %p4290_p7 = scmp.lt.s32.totalorder %s3591_s16, %s3591_s16 }
0x1001   :  { %v3299_v28 = vsub.f32 %v3283_v18, %v3297_v23  ;;  %p4286_p6 = scmp.ne.s32.totalorder %s3591_s16, %s4285_s25  ;;  %p4291_p8 = scmp.lt.s32.totalorder %s4285_s25, %s4285_s25 }
0x1002   :  { %v3302_v31 = vmul.f32 %v3300_v26, %v3300_v26 }
0x1003   :  { %v3301_v29 = vmul.f32 %v3299_v28, %v3299_v28  ;;  %p4292_p9 = por %p4291_p8, %p4290_p7 }
0x1004   :  { %v3306_v32 = vsel %vm159_vm0, %v3302_v31, 0.0 }
0x1005   :  { %v3303_v30 = vsel %vm159_vm0, %v3301_v29, 0.0  ;;  %p4293_p10 = pnand %p4292_p9, %p4286_p6 }
0x1006   :  { %3304 = vadd.xlane.f32.xlu0 %v3303_v30  ;;  %v3672_v30 = vld [vmem:[%s5062_s5] ss:$0 sm:$0xff] }
0x100a   :  { %3307 = vadd.xlane.f32.xlu0 %v3306_v32 }
0x1093   :  { %v3305_v41 = vpop.xlane.xlu0 %3304 }
0x1094   :  { %v3309_v42 = vmul.f32 0.03125, %v3305_v41 }
0x1096   :  { %v3311_v24 = vadd.f32 1e-05, %v3309_v42 }
0x1097   :  { %v3308_v43 = vpop.xlane.xlu0 %3307 }
0x1098   :  { %4141 = vrsqrt.f32 %v3311_v24  ;;  %v3310_v44 = vmul.f32 0.03125, %v3308_v43 }
0x109a   :  { %v3312_v45 = vadd.f32 1e-05, %v3310_v44 }
0x109c   :  { %4143 = vrsqrt.f32 %v3312_v45 }
0x10a2   :  { %v4142_v46 = vpop.eup %4141 }
0x10a3   :  { %v3315_v47 = vmul.f32 %v4142_v46, %v3299_v28 }
0x10a5   :  { %v3317_v48 = vmul.f32 %v4770_v25, %v3315_v47 }
0x10a6   :  { %v4144_v37 = vpop.eup %4143 }
0x10a7   :  { %v3316_v49 = vmul.f32 %v4144_v37, %v3300_v26  ;;  %v3319_v50 = vadd.f32 %v4775_v27, %v3317_v48 }
0x10a9   :  { %3987 = vmatprep.mubr.msk.f32.mxu1 %vm159_vm0, %v3319_v50  ;;  %v3318_v51 = vmul.f32 %v4770_v25, %v3316_v49 }
0x10ab   :  { %v3320_v52 = vadd.f32 %v4775_v27, %v3318_v51 }
0x10ad   :  { %3988 = vmatmul.mubr.msk.f32.vlgmr.msra.gmra.mrb[38].mxu1 %vm159_vm0, %v3320_v52 }
0x1180   :  { %v3989_v53 = vpop.f32.mrb[38].mxu1 }
0x1181   :  { %v3412_v54 = vadd.f32 %v3989_v53, %v3667_v8  ;;  %v3406_v55 = vpop.f32.mrb[39].mxu1 }
0x1182   :  { %v3407_v56 = vadd.f32 %v3667_v8, %v3406_v55 }
0x1183   :  { %v3416_v0 = vmax.f32 %v3412_v54, 0.0 }
0x1184   :  { %v3415_v57 = vmax.f32 %v3407_v56, 0.0 }
0x1185   :  { %v3420_v58 = vsel %vm159_vm0, %v3416_v0, 0.0 }
0x1186   :  { %3421 = vadd.xlane.f32.xlu0 %v3420_v58  ;;  %v3417_v59 = vsel %vm159_vm0, %v3415_v57, 0.0 }
0x1187   :  { %3418 = vadd.xlane.f32.xlu1 %v3417_v59 }
0x1213   :  { %v3422_v25 = vpop.xlane.xlu0 %3421 }
0x1214   :  { %v3424_v27 = vmul.f32 0.03125, %v3422_v25  ;;  %v3419_v60 = vpop.xlane.xlu1 %3418 }
0x1215   :  { %v3423_v61 = vmul.f32 0.03125, %v3419_v60 }
0x1216   :  { %v3426_v62 = vsub.f32 %v3416_v0, %v3424_v27 }
0x1217   :  { %v3425_v63 = vsub.f32 %v3415_v57, %v3423_v61 }
0x1218   :  { %v3428_v1 = vmul.f32 %v3426_v62, %v3426_v62 }
0x1219   :  { %v3427_v2 = vmul.f32 %v3425_v63, %v3425_v63 }
0x121a   :  { %v3432_v3 = vsel %vm159_vm0, %v3428_v1, 0.0 }
0x121b   :  { %3433 = vadd.xlane.f32.xlu0 %v3432_v3  ;;  %v3429_v13 = vsel %vm159_vm0, %v3427_v2, 0.0 }
0x121c   :  { %3430 = vadd.xlane.f32.xlu1 %v3429_v13 }
0x12a8   :  { %v3434_v10 = vpop.xlane.xlu0 %3433 }
0x12a9   :  { %v3436_v12 = vmul.f32 0.03125, %v3434_v10  ;;  %v3431_v14 = vpop.xlane.xlu1 %3430 }
0x12aa   :  { %v3435_v15 = vmul.f32 0.03125, %v3431_v14 }
0x12ab   :  { %v3438_v16 = vadd.f32 1e-05, %v3436_v12 }
0x12ac   :  { %v3437_v17 = vadd.f32 1e-05, %v3435_v15 }
0x12ad   :  { %4145 = vrsqrt.f32 %v3438_v16 }
0x12ae   :  { %4147 = vrsqrt.f32 %v3437_v17 }
0x12b7   :  { %v4146_v18 = vpop.eup %4145 }
0x12b8   :  { %v4148_v20 = vpop.eup %4147  ;;  %v3442_v38 = vmul.f32 %v4146_v18, %v3426_v62 }
0x12b9   :  { %v3441_v21 = vmul.f32 %v4148_v20, %v3425_v63 }
0x12ba   :  { %v3450_v23 = vmul.f32 %v3670_v19, %v3442_v38 }
0x12bb   :  { %v3449_v26 = vmul.f32 %v3670_v19, %v3441_v21 }
0x12bc   :  { %v3458_v29 = vadd.f32 %v3671_v22, %v3450_v23 }
0x12bd   :  { %v3457_v28 = vadd.f32 %v3671_v22, %v3449_v26 }
0x12bf   :  { %3998 = vmatprep.mubr.msk.f32.mxu0 %vm159_vm0, %v3457_v28 }
0x12c0   :  { %3999 = vmatmul.mubr.msk.f32.vlgmr.msra.gmra.mrb[34].mxu0 %vm159_vm0, %v3458_v29 }
0x1393   :  { %v4000_v31 = vpop.f32.mrb[34].mxu0 }
0x1394   :  { %v3548_v32 = vadd.f32 %v4000_v31, %v3672_v30  ;;  %v3542_v33 = vpop.f32.mrb[35].mxu0 }
0x1395   :  { %v3543_v34 = vadd.f32 %v3672_v30, %v3542_v33 }
0x1396   :  { %v3552_v35 = vmax.f32 %v3548_v32, 0.0 }
0x1397   :  { %v3551_v36 = vmax.f32 %v3543_v34, 0.0 }
0x1398   :  { %v3556_v39 = vsel %vm159_vm0, %v3552_v35, 0.0 }
0x1399   :  { %3557 = vadd.xlane.f32.xlu0 %v3556_v39  ;;  %v3553_v40 = vsel %vm159_vm0, %v3551_v36, 0.0 }
0x139a   :  { %3554 = vadd.xlane.f32.xlu1 %v3553_v40 }
0x1426   :  { %v3558_v41 = vpop.xlane.xlu0 %3557 }
0x1427   :  { %v3560_v42 = vmul.f32 0.03125, %v3558_v41  ;;  %v3555_v24 = vpop.xlane.xlu1 %3554 }
0x1428   :  { %v3559_v43 = vmul.f32 0.03125, %v3555_v24 }
0x1429   :  { %v3562_v44 = vsub.f32 %v3552_v35, %v3560_v42 }
0x142a   :  { %v3561_v45 = vsub.f32 %v3551_v36, %v3559_v43 }
0x142b   :  { %v3564_v46 = vmul.f32 %v3562_v44, %v3562_v44 }
0x142c   :  { %v3563_v47 = vmul.f32 %v3561_v45, %v3561_v45 }
0x142d   :  { %v3568_v48 = vsel %vm159_vm0, %v3564_v46, 0.0 }
0x142e   :  { %3569 = vadd.xlane.f32.xlu0 %v3568_v48  ;;  %v3565_v37 = vsel %vm159_vm0, %v3563_v47, 0.0 }
0x142f   :  { %3566 = vadd.xlane.f32.xlu1 %v3565_v37 }
0x14bb   :  { %v3570_v49 = vpop.xlane.xlu0 %3569 }
0x14bc   :  { %v3572_v50 = vmul.f32 0.03125, %v3570_v49  ;;  %v3567_v51 = vpop.xlane.xlu1 %3566 }
0x14bd   :  { %v3571_v52 = vmul.f32 0.03125, %v3567_v51 }
0x14be   :  { %v3574_v8 = vadd.f32 1e-05, %v3572_v50 }
0x14bf   :  { %v3573_v53 = vadd.f32 1e-05, %v3571_v52 }
0x14c0   :  { %4149 = vrsqrt.f32 %v3574_v8 }
0x14c1   :  { %4151 = vrsqrt.f32 %v3573_v53 }
0x14ca   :  { %v4150_v54 = vpop.eup %4149 }
0x14cb   :  { %v4152_v55 = vpop.eup %4151  ;;  %v3578_v56 = vmul.f32 %v4150_v54, %v3562_v44 }
0x14cc   :  { %v3577_v0 = vmul.f32 %v4152_v55, %v3561_v45 }
0x14cd   :  { %v3580_v57 = vmul.f32 %v3670_v19, %v3578_v56 }
0x14ce   :  { %v3579_v58 = vmul.f32 %v3670_v19, %v3577_v0 }
0x14cf   :  { %v3582_v59 = vadd.f32 %v3671_v22, %v3580_v57 }
0x14d0   :  { %v3581_v25 = vadd.f32 %v3671_v22, %v3579_v58 }
0x14d1   :  { %3584 = vst.msk [vmem:[#allocation13 + $0x8] sm:$0xff] %vm159_vm0, %v3582_v59 }
0x14d2   :  { %3583 = vst.msk [vmem:[#allocation13] sm:$0xff] %vm159_vm0, %v3581_v25 }
0x14d3   :  { %4296 = shalt.err (!%p4293_p10)
}
0x14d4   :  { %s5063_s24 = sld [smem:[#allocation22_spill]] }
0x14da   :  { %s4297_s7 = scalar_lea.hbm %s5063_s24, 256 }
0x14db   :  { %p4298_p11 = scmp.ne.s32.totalorder %s5063_s24, %s4297_s7  ;;  %p4301_p12 = scmp.lt.u32.totalorder %s4297_s7, %s5063_s24 }
0x14dd   :  { %p4303_p13 = pnand %p4301_p12, %p4298_p11 }
0x14df   :  { %4306 = shalt.err (!%p4303_p13)
}
0x14e0   :  { %3596 = dma.vmem_to_hbm [thread:$0]  %s3591_s16, 256, %s5063_s24, [#allocation4], %s4319_s22, %s4319_s22, %s4320_s23  }
0x14e1   :  { %4315 = dma.done.wait [#allocation4], 256  }
0x14e2   :  { %4316 = vsyncadd [#allocation4], 4294967040 }
0x14e3   :  { %3600 = vsyncpa [#allocation3], 1 }
0x14e4   :  { %3601 = vsyncpa [#allocation6], 1 }
0x14e5   :  { %3602 = vsyncpa [#allocation9], 1 }
0x14e6   :  { %3603 = vsyncpa [#allocation12], 1 }
0x14e7   :  { %3604 = vsyncpa [#allocation4], 1 }

</bundles_post_ra>
